<compile_context>
chip_gen: v5e
topology: v5e:2x2
jax: 0.10.0
libtpu: 0.0.40
codegen_flags: <defaults>
</compile_context>

<pallas_src>
import jax
import jax.numpy as jnp
from jax import lax
from jax.experimental import pallas as pl
from jax.experimental.pallas import tpu as pltpu

# ---------------- model hyper-params (small, consistent with the module) ----------------
CHANNELS = 1
DATA_LEN = 2
IMG_SHAPE = (CHANNELS, DATA_LEN, 257)            # img_shape = (opt.channels, opt.data_len, 257)
D_IN = CHANNELS * DATA_LEN * 257                 # np.prod(img_shape) = 514  (no padding)
HIDDEN = 512
LATENT = 32                                      # opt.latent_dim
HEAD_PAD = 128                                   # fused head width: mu 0-31, logvar 32-63, zeros 64-127
BN_EPS = 1e-5
NEG_SLOPE = 0.2
TB_DEFAULT = 1024                                # batch tile (per-step VMEM well under limits)


def _round_up(x, m):
    return ((x + m - 1) // m) * m


def _leaky_relu(x):
    return jnp.where(x >= 0, x, NEG_SLOPE * x)


def encoder_forward(img_nchw, params, noise, tb=TB_DEFAULT):
    """Runs the Encoder forward pass; returns z of shape (B, LATENT)."""
    B = img_nchw.shape[0]
    # BatchNorm1d in training mode needs B >= 2 (PyTorch raises for B == 1).
    assert B >= 2, "BatchNorm1d training-mode stats require batch size >= 2"

    # reshape + cast to bf16 in one wrapper op (torch .view order); NO feature-dim pad.
    img_flat = img_nchw.reshape(B, D_IN).astype(jnp.bfloat16)

    # Batch tiling: pad B to a multiple of the (sublane-aligned) tile so there are no ragged blocks.
    tb_eff = min(tb, _round_up(B, 8))
    Bp = _round_up(B, tb_eff)
    img_flat = jnp.pad(img_flat, ((0, Bp - B), (0, 0)))
    noise_p = jnp.pad(noise.astype(jnp.float32), ((0, Bp - B), (0, 0)))
    num_tiles = Bp // tb_eff
    grid = (num_tiles,)

    # ------------- pass 1: Linear -> LeakyReLU -> Linear, emit h2 (bf16) + per-tile BN stats -------------
    def pass1_kernel(img_ref, w1_ref, b1_ref, w2_ref, b2_ref, h2_ref, stats_ref):
        x = img_ref[...]                                                         # (TB, 514) bf16
        h1 = jnp.dot(x, w1_ref[...], preferred_element_type=jnp.float32) + b1_ref[...]
        h1 = _leaky_relu(h1)
        h2 = jnp.dot(h1.astype(jnp.bfloat16), w2_ref[...],
                     preferred_element_type=jnp.float32) + b2_ref[...]           # (TB, 512) f32
        h2_ref[...] = h2.astype(jnp.bfloat16)

        # mask out batch-padding rows so BN statistics only see the true B rows
        row = pl.program_id(0) * tb_eff + lax.broadcasted_iota(jnp.int32, (tb_eff, 1), 0)
        hm = jnp.where(row < B, h2, 0.0)
        stats_ref[...] = jnp.concatenate(
            [jnp.sum(hm, axis=0, keepdims=True),
             jnp.sum(hm * hm, axis=0, keepdims=True)], axis=0)                   # (2, 512) f32

    h2_full, stats_partial = pl.pallas_call(
        pass1_kernel,
        out_shape=(jax.ShapeDtypeStruct((Bp, HIDDEN), jnp.bfloat16),
                   jax.ShapeDtypeStruct((num_tiles, 2, HIDDEN), jnp.float32)),
        grid=grid,
        in_specs=[
            pl.BlockSpec((tb_eff, D_IN), lambda i: (i, 0)),        # full-extent K = 514
            pl.BlockSpec((D_IN, HIDDEN), lambda i: (0, 0)),        # weights: VMEM-resident (block 0)
            pl.BlockSpec((1, HIDDEN), lambda i: (0, 0)),
            pl.BlockSpec((HIDDEN, HIDDEN), lambda i: (0, 0)),
            pl.BlockSpec((1, HIDDEN), lambda i: (0, 0)),
        ],
        out_specs=(pl.BlockSpec((tb_eff, HIDDEN), lambda i: (i, 0)),
                   pl.BlockSpec((None, 2, HIDDEN), lambda i: (i, 0, 0))),        # per-tile partials
        compiler_params=pltpu.CompilerParams(
            dimension_semantics=("parallel",),                     # megacore-shardable on v7x
            vmem_limit_bytes=48 * 1024 * 1024),
    )(img_flat, params["w1"], params["b1"], params["w2"], params["b2"])

    # tiny XLA reduction of the per-tile partial statistics: (num_tiles, 2, 512) -> (2, 512)
    stats = jnp.sum(stats_partial, axis=0)

    # ------------- pass 2: BN normalize + LeakyReLU + fused 128-lane head + reparameterization -------------
    def pass2_kernel(h2_ref, stats_ref, gamma_ref, beta_ref, wh_ref, bh_ref, noise_ref, out_ref):
        inv_b = 1.0 / B
        st = stats_ref[...]
        mean = st[0:1, :] * inv_b
        ex2 = st[1:2, :] * inv_b
        var = jnp.maximum(ex2 - mean * mean, 0.0)                # biased batch var (training mode)
        scale = gamma_ref[...] * lax.rsqrt(var + BN_EPS)
        shift = beta_ref[...] - mean * scale
        h2n = _leaky_relu(h2_ref[...].astype(jnp.float32) * scale + shift)       # (TB, 512) f32

        head = jnp.dot(h2n.astype(jnp.bfloat16), wh_ref[...],
                       preferred_element_type=jnp.float32) + bh_ref[...]         # (TB, 128) full tile
        mu = head[:, :LATENT]
        logvar = head[:, LATENT:2 * LATENT]
        out_ref[...] = noise_ref[...] * jnp.exp(logvar * 0.5) + mu               # (TB, 32)

    z_full = pl.pallas_call(
        pass2_kernel,
        out_shape=jax.ShapeDtypeStruct((Bp, LATENT), jnp.float32),
        grid=grid,
        in_specs=[
            pl.BlockSpec((tb_eff, HIDDEN), lambda i: (i, 0)),
            pl.BlockSpec((2, HIDDEN), lambda i: (0, 0)),
            pl.BlockSpec((1, HIDDEN), lambda i: (0, 0)),
            pl.BlockSpec((1, HIDDEN), lambda i: (0, 0)),
            pl.BlockSpec((HIDDEN, HEAD_PAD), lambda i: (0, 0)),
            pl.BlockSpec((1, HEAD_PAD), lambda i: (0, 0)),
            pl.BlockSpec((tb_eff, LATENT), lambda i: (i, 0)),
        ],
        out_specs=pl.BlockSpec((tb_eff, LATENT), lambda i: (i, 0)),
        compiler_params=pltpu.CompilerParams(dimension_semantics=("parallel",)),
    )(h2_full, stats, params["gamma"], params["beta"],
      params["w_head"], params["b_head"], noise_p)

    return z_full[:B]                                            # only z is consumed -> only z written


def init_params(key):
    ks = jax.random.split(key, 8)

    def lin(kw, kb, fan_in, fan_out):
        bound = 1.0 / jnp.sqrt(fan_in)
        w = jax.random.uniform(kw, (fan_in, fan_out), jnp.float32, -bound, bound)
        b = jax.random.uniform(kb, (1, fan_out), jnp.float32, -bound, bound)
        return w, b

    w1, b1 = lin(ks[0], ks[1], D_IN, HIDDEN)
    w2, b2 = lin(ks[2], ks[3], HIDDEN, HIDDEN)
    wmu, bmu = lin(ks[4], ks[5], HIDDEN, LATENT)
    wlv, blv = lin(ks[6], ks[7], HIDDEN, LATENT)

    # Fuse mu|logvar heads and pad to a full 128-lane output tile (zeros in lanes 64-127)
    w_head = jnp.concatenate([wmu, wlv], axis=1)
    b_head = jnp.concatenate([bmu, blv], axis=1)
    w_head = jnp.pad(w_head, ((0, 0), (0, HEAD_PAD - 2 * LATENT)))
    b_head = jnp.pad(b_head, ((0, 0), (0, HEAD_PAD - 2 * LATENT)))

    gamma = jnp.ones((1, HIDDEN), jnp.float32)     # BatchNorm1d default affine init
    beta = jnp.zeros((1, HIDDEN), jnp.float32)
    return dict(
        w1=w1.astype(jnp.bfloat16), b1=b1,
        w2=w2.astype(jnp.bfloat16), b2=b2,
        gamma=gamma, beta=beta,
        w_head=w_head.astype(jnp.bfloat16), b_head=b_head,
    )


if __name__ == "__main__":
    key = jax.random.PRNGKey(0)
    k_param, k_img, k_noise = jax.random.split(key, 3)

    B = 2
    img = jax.random.normal(k_img, (B,) + IMG_SHAPE, jnp.float32)       # NCHW-style input
    noise = jax.random.normal(k_noise, (B, LATENT), jnp.float32)
    # TODO(synk): PyTorch draws sampled_z from np.random.normal at call time; here a fixed
    # deterministic normal sample is supplied by the caller (RNG source differs, semantics identical).

    params = init_params(k_param)
    z = encoder_forward(img, params, noise)
    jax.block_until_ready(z)
    assert z.shape == (B, LATENT) and z.dtype == jnp.float32
    print("KERNEL_OK")
</pallas_src>

<mosaic_0001>
module attributes {stable_mosaic.version = 11 : i64} {
  func.func @pass1_kernel(%arg0: i32, %arg1: memref<8x514xbf16, #tpu.memory_space<vmem>>, %arg2: memref<514x512xbf16, #tpu.memory_space<vmem>>, %arg3: memref<1x512xf32, #tpu.memory_space<vmem>>, %arg4: memref<512x512xbf16, #tpu.memory_space<vmem>>, %arg5: memref<1x512xf32, #tpu.memory_space<vmem>>, %arg6: memref<8x512xbf16, #tpu.memory_space<vmem>>, %arg7: memref<1x2x512xf32, #tpu.memory_space<vmem>>) attributes {dimension_semantics = [#tpu.dimension_semantics<parallel>], iteration_bounds = array<i64: 1>, scalar_prefetch = 0 : i64, scratch_operands = 0 : i64, tpu.core_type = #tpu.core_type<tc>, window_params = [{transform_indices = @transform_0, window_bounds = array<i64: 8, 514>}, {pipeline_mode = #tpu.pipeline_mode<synchronous>, transform_indices = @transform_1, window_bounds = array<i64: 514, 512>}, {pipeline_mode = #tpu.pipeline_mode<synchronous>, transform_indices = @transform_2, window_bounds = array<i64: 1, 512>}, {pipeline_mode = #tpu.pipeline_mode<synchronous>, transform_indices = @transform_3, window_bounds = array<i64: 512, 512>}, {pipeline_mode = #tpu.pipeline_mode<synchronous>, transform_indices = @transform_4, window_bounds = array<i64: 1, 512>}, {transform_indices = @transform_5, window_bounds = array<i64: 8, 512>}, {transform_indices = @transform_6, window_bounds = array<i64: 1, 2, 512>}]} {
    %c0 = arith.constant 0 : index
    %c0_0 = arith.constant 0 : index
    %0 = vector.load %arg1[%c0, %c0_0] : memref<8x514xbf16, #tpu.memory_space<vmem>>, vector<8x514xbf16>
    %c0_1 = arith.constant 0 : index
    %c0_2 = arith.constant 0 : index
    %1 = vector.load %arg2[%c0_1, %c0_2] : memref<514x512xbf16, #tpu.memory_space<vmem>>, vector<514x512xbf16>
    %cst = arith.constant dense<0.000000e+00> : vector<8x512xf32>
    %2 = tpu.matmul %0, %1, %cst {dimension_numbers = #tpu.dot_dimension_numbers<[1], [0], [0], [1], [0, 0, 1, 1], [], []>} : vector<8x514xbf16>, vector<514x512xbf16>, vector<8x512xf32> -> vector<8x512xf32>
    %c0_3 = arith.constant 0 : index
    %c0_4 = arith.constant 0 : index
    %3 = vector.load %arg3[%c0_3, %c0_4] : memref<1x512xf32, #tpu.memory_space<vmem>>, vector<1x512xf32>
    %4 = vector.broadcast %3 : vector<1x512xf32> to vector<8x512xf32>
    %5 = arith.addf %2, %4 : vector<8x512xf32>
    %cst_5 = arith.constant 0.000000e+00 : f32
    %6 = vector.broadcast %cst_5 : f32 to vector<8x512xf32>
    %7 = arith.cmpf oge, %5, %6 : vector<8x512xf32>
    %cst_6 = arith.constant 2.000000e-01 : f32
    %8 = vector.broadcast %cst_6 : f32 to vector<8x512xf32>
    %9 = arith.mulf %8, %5 : vector<8x512xf32>
    %10 = arith.select %7, %5, %9 : vector<8x512xi1>, vector<8x512xf32>
    %11 = arith.truncf %10 : vector<8x512xf32> to vector<8x512xbf16>
    %c0_7 = arith.constant 0 : index
    %c0_8 = arith.constant 0 : index
    %12 = vector.load %arg4[%c0_7, %c0_8] : memref<512x512xbf16, #tpu.memory_space<vmem>>, vector<512x512xbf16>
    %cst_9 = arith.constant dense<0.000000e+00> : vector<8x512xf32>
    %13 = tpu.matmul %11, %12, %cst_9 {dimension_numbers = #tpu.dot_dimension_numbers<[1], [0], [0], [1], [0, 0, 1, 1], [], []>} : vector<8x512xbf16>, vector<512x512xbf16>, vector<8x512xf32> -> vector<8x512xf32>
    %c0_10 = arith.constant 0 : index
    %c0_11 = arith.constant 0 : index
    %14 = vector.load %arg5[%c0_10, %c0_11] : memref<1x512xf32, #tpu.memory_space<vmem>>, vector<1x512xf32>
    %15 = vector.broadcast %14 : vector<1x512xf32> to vector<8x512xf32>
    %16 = arith.addf %13, %15 : vector<8x512xf32>
    %17 = arith.truncf %16 : vector<8x512xf32> to vector<8x512xbf16>
    %c0_12 = arith.constant 0 : index
    %c0_13 = arith.constant 0 : index
    %18 = vector.load %arg6[%c0_12, %c0_13] : memref<8x512xbf16, #tpu.memory_space<vmem>>, vector<8x512xbf16>
    tpu.vector_store %arg6[%c0_12, %c0_13], %17 {strides = array<i32>} : memref<8x512xbf16, #tpu.memory_space<vmem>>, vector<8x512xbf16>,
    %c8_i32 = arith.constant 8 : i32
    %19 = arith.muli %arg0, %c8_i32 : i32
    %20 = tpu.iota {dimensions = array<i32: 0>} : vector<8x1xi32>
    %21 = vector.broadcast %19 : i32 to vector<8x1xi32>
    %22 = arith.addi %21, %20 : vector<8x1xi32>
    %c2_i32 = arith.constant 2 : i32
    %23 = vector.broadcast %c2_i32 : i32 to vector<8x1xi32>
    %24 = arith.cmpi slt, %22, %23 : vector<8x1xi32>
    %cst_14 = arith.constant 0.000000e+00 : f32
    %25 = vector.shape_cast %24 : vector<8x1xi1> to vector<8x1xi1>
    %26 = vector.broadcast %25 : vector<8x1xi1> to vector<8x512xi1>
    %27 = vector.broadcast %cst_14 : f32 to vector<8x512xf32>
    %28 = arith.select %26, %16, %27 : vector<8x512xi1>, vector<8x512xf32>
    %cst_15 = arith.constant dense<0.000000e+00> : vector<512xf32>
    %29 = vector.multi_reduction <add>, %28, %cst_15 [0] : vector<8x512xf32> to vector<512xf32>
    %30 = vector.shape_cast %29 : vector<512xf32> to vector<1x512xf32>
    %31 = arith.mulf %28, %28 : vector<8x512xf32>
    %cst_16 = arith.constant dense<0.000000e+00> : vector<512xf32>
    %32 = vector.multi_reduction <add>, %31, %cst_16 [0] : vector<8x512xf32> to vector<512xf32>
    %33 = vector.shape_cast %32 : vector<512xf32> to vector<1x512xf32>
    %34 = tpu.concatenate %30, %33 in 0 : vector<1x512xf32>, vector<1x512xf32> -> vector<2x512xf32>
    %c0_17 = arith.constant 0 : index
    %c0_18 = arith.constant 0 : index
    %c0_19 = arith.constant 0 : index
    %35 = vector.load %arg7[%c0_17, %c0_18, %c0_19] : memref<1x2x512xf32, #tpu.memory_space<vmem>>, vector<1x2x512xf32>
    %36 = vector.shape_cast %35 : vector<1x2x512xf32> to vector<2x512xf32>
    %37 = vector.shape_cast %34 : vector<2x512xf32> to vector<1x2x512xf32>
    tpu.vector_store %arg7[%c0_17, %c0_18, %c0_19], %37 {strides = array<i32>} : memref<1x2x512xf32, #tpu.memory_space<vmem>>, vector<1x2x512xf32>,
    return
  }
  func.func @transform_0(%arg0: i32) -> (i32, i32) {
    %c0_i32 = arith.constant 0 : i32
    %c0_i32_0 = arith.constant 0 : i32
    return %arg0, %c0_i32 : i32, i32
  }
  func.func @transform_1(%arg0: i32) -> (i32, i32) {
    %c0_i32 = arith.constant 0 : i32
    %c0_i32_0 = arith.constant 0 : i32
    %c0_i32_1 = arith.constant 0 : i32
    return %c0_i32, %c0_i32_0 : i32, i32
  }
  func.func @transform_2(%arg0: i32) -> (i32, i32) {
    %c0_i32 = arith.constant 0 : i32
    %c0_i32_0 = arith.constant 0 : i32
    %c0_i32_1 = arith.constant 0 : i32
    return %c0_i32, %c0_i32_0 : i32, i32
  }
  func.func @transform_3(%arg0: i32) -> (i32, i32) {
    %c0_i32 = arith.constant 0 : i32
    %c0_i32_0 = arith.constant 0 : i32
    %c0_i32_1 = arith.constant 0 : i32
    return %c0_i32, %c0_i32_0 : i32, i32
  }
  func.func @transform_4(%arg0: i32) -> (i32, i32) {
    %c0_i32 = arith.constant 0 : i32
    %c0_i32_0 = arith.constant 0 : i32
    %c0_i32_1 = arith.constant 0 : i32
    return %c0_i32, %c0_i32_0 : i32, i32
  }
  func.func @transform_5(%arg0: i32) -> (i32, i32) {
    %c0_i32 = arith.constant 0 : i32
    %c0_i32_0 = arith.constant 0 : i32
    return %arg0, %c0_i32 : i32, i32
  }
  func.func @transform_6(%arg0: i32) -> (i32, i32, i32) {
    %c0_i32 = arith.constant 0 : i32
    %c0_i32_0 = arith.constant 0 : i32
    %c0_i32_1 = arith.constant 0 : i32
    return %arg0, %c0_i32, %c0_i32_0 : i32, i32, i32
  }
}

</mosaic_0001>

<bundles_post_ra>
// kernel: tpu_custom_call.1
= control target key start
LH: loop header
LB: loop body
LE: loop exit
PB: predicated region body
PF: predicated region fallthrough
CT: control target
= control target key end

     0   :  { %12 = vsyncpa [#allocation3], 0  ;;  %s3945_s0 = inlined_call_operand.hbm [shape: bf16[8,514], index: 0, kind: input, shape index: {}]   ;;  %s3946_s1 = inlined_call_operand.hbm [shape: bf16[514,512], index: 1, kind: input, shape index: {}]   ;;  %s3947_s2 = inlined_call_operand.hbm [shape: f32[1,512], index: 2, kind: input, shape index: {}]   ;;  %s3948_s3 = inlined_call_operand.hbm [shape: bf16[512,512], index: 3, kind: input, shape index: {}]   ;;  %s3949_s4 = inlined_call_operand.hbm [shape: f32[1,512], index: 4, kind: input, shape index: {}]   ;;  %s3950_s5 = inlined_call_operand.hbm [shape: bf16[8,512], index: 5, kind: output, shape index: {0}]   ;;  %s3951_s6 = inlined_call_operand.hbm [shape: f32[1,2,512], index: 6, kind: output, shape index: {1}]  }
   0x1   :  { %13 = vsyncpa [#allocation6], 0 }
   0x2   :  { %14 = vsyncpa [#allocation9], 0 }
   0x3   :  { %15 = vsyncpa [#allocation4], 0  ;;  %s32_s23 = sshll.u32 %s3946_s1, 4  ;;  %s33_s23 = int_to_ptr.hbm [resolvable:$true] %s32_s23 }
   0x4   :  { %16 = vsyncpa [#allocation13], 0  ;;  %s3779_s24 = smov [#allocation5]   ;;  %s56_s28 = sshll.u32 %s3948_s3, 4  ;;  %s57_s28 = int_to_ptr.hbm [resolvable:$true] %s56_s28 }
   0x5   :  { %s34_s25 = sshll.u32 %s3779_s24, 4  ;;  %s3780_s29 = smov 256   ;;  %s35_s25 = int_to_ptr.vmem [resolvable:$true] %s34_s25 }
   0x6   :  { %s3781_s30 = smov 16   ;;  %s3782_s7 = smov [#allocation8]  }
   0x7   :  { %40 = dma.hbm_to_vmem [thread:$0]  %s33_s23, 16640, %s35_s25, [#allocation6], %s3780_s29, %s3780_s29, %s3781_s30  }
   0x8   :  { %s58_s8 = sshll.u32 %s3782_s7, 4  ;;  %s22_s11 = sshll.u32 %s3945_s0, 4  ;;  %s59_s8 = int_to_ptr.vmem [resolvable:$true] %s58_s8  ;;  %s23_s11 = int_to_ptr.hbm [resolvable:$true] %s22_s11 }
   0x9   :  { %64 = dma.hbm_to_vmem [thread:$0]  %s57_s28, 16384, %s59_s8, [#allocation9], %s3780_s29, %s3780_s29, %s3781_s30  }
   0xa   :  { %s46_s13 = sshll.u32 %s3947_s2, 4  ;;  %s3783_s14 = smov [#allocation2]   ;;  %s47_s13 = int_to_ptr.hbm [resolvable:$true] %s46_s13 }
   0xb   :  { %s24_s15 = sshll.u32 %s3783_s14, 4  ;;  %s3784_s3 = smov [#allocation7]   ;;  %s25_s15 = int_to_ptr.vmem [resolvable:$true] %s24_s15 }
   0xc   :  { %27 = dma.hbm_to_vmem [thread:$0]  %s23_s11, 320, %s25_s15, [#allocation3]  }
   0xd   :  { %s48_s16 = sshll.u32 %s3784_s3, 4  ;;  %s70_s19 = sshll.u32 %s3949_s4, 4  ;;  %s49_s16 = int_to_ptr.vmem [resolvable:$true] %s48_s16  ;;  %s71_s19 = int_to_ptr.hbm [resolvable:$true] %s70_s19 }
   0xe   :  { %51 = dma.hbm_to_vmem [thread:$0]  %s47_s13, 64, %s49_s16, [#allocation6]  }
   0xf   :  { %s3785_s0 = smov [#allocation10]  }
  0x10   :  { %s72_s20 = sshll.u32 %s3785_s0, 4  ;;  %s73_s20 = int_to_ptr.vmem [resolvable:$true] %s72_s20 }
  0x11   :  { %75 = dma.hbm_to_vmem [thread:$0]  %s71_s19, 64, %s73_s20, [#allocation9]  }
  0x12   :  { %3769 = dma.done.wait [#allocation3], 320  }
  0x13   :  { %3770 = vsyncadd [#allocation3], 4294966976 }
  0x14   :  { %3771 = dma.done.wait [#allocation6], 16704  }
  0x15   :  { %3772 = vsyncadd [#allocation6], 4294950592 }
  0x16   :  { %3773 = dma.done.wait [#allocation9], 16448  }
  0x17   :  { %3774 = vsyncadd [#allocation9], 4294950848  ;;  %v2422_v0 = vld [vmem:[#allocation5 + $0xe0] sm:$0xf]  ;;  %v3366_v1 = vld [vmem:[#allocation5 + $0xec] sm:$0xf0] }
  0x18   :  { %v2550_v2 = vld [vmem:[#allocation5 + $0x1e0] sm:$0xf]  ;;  %v2423_v3 = vor.u32 %v3366_v1, %v2422_v0  ;;  %v3398_v4 = vld [vmem:[#allocation5 + $0x1ec] sm:$0xf0]  ;;  %vm911_vm0 = vcmask 1040384   ;;  %vm907_vm1 = vcmask 15360  }
  0x19   :  { %v2678_v5 = vld [vmem:[#allocation5 + $0x2e0] sm:$0xf]  ;;  %v3430_v6 = vld [vmem:[#allocation5 + $0x2ec] sm:$0xf0]  ;;  %v2551_v7 = vor.u32 %v3398_v4, %v2550_v2  ;;  %vm2265_vm7 = vcmask 1041408   ;;  %s3786_s2 = smov [#allocation11]  }
  0x1a   :  { %v2679_v8 = vor.u32 %v3430_v6, %v2678_v5  ;;  %v2806_v9 = vld [vmem:[#allocation5 + $0x3e0] sm:$0xf]  ;;  %v3462_v10 = vld [vmem:[#allocation5 + $0x3ec] sm:$0xf0]  ;;  %924 = vmatpush.bf16.msra.mxu0 %v2423_v3  ;;  %s2278_s4 = sshll.u32 %s3786_s2, 4  ;;  %s2280_s23 = sshll.u32 %s3950_s5, 4  ;;  %s2279_s4 = int_to_ptr.vmem [resolvable:$true] %s2278_s4  ;;  %s2281_s23 = int_to_ptr.hbm [resolvable:$true] %s2280_s23 }
  0x1b   :  { %v2406_v11 = vld [vmem:[#allocation5 + $0xc0] sm:$0xf]  ;;  %v2807_v12 = vor.u32 %v3462_v10, %v2806_v9  ;;  %v3362_v13 = vld [vmem:[#allocation5 + $0xcc] sm:$0xf0]  ;;  %937 = vmatpush.bf16.msra.mxu1 %v2551_v7  ;;  %vm2267_vm8 = vcmask 1045508   ;;  %s3787_s5 = smov [#allocation12]  }
  0x1c   :  { %v2534_v14 = vld [vmem:[#allocation5 + $0x1c0] sm:$0xf]  ;;  %v3394_v15 = vld [vmem:[#allocation5 + $0x1cc] sm:$0xf0]  ;;  %950 = vmatpush.bf16.msra.mxu2 %v2679_v8  ;;  %v2407_v16 = vor.u32 %v3362_v13, %v2406_v11  ;;  %s2289_s24 = sshll.u32 %s3787_s5, 4  ;;  %s2291_s27 = sshll.u32 %s3951_s6, 4  ;;  %s2290_s24 = int_to_ptr.vmem [resolvable:$true] %s2289_s24  ;;  %s2292_s27 = int_to_ptr.hbm [resolvable:$true] %s2291_s27 }
  0x1d   :  { %v2535_v17 = vor.u32 %v3394_v15, %v2534_v14  ;;  %v2662_v18 = vld [vmem:[#allocation5 + $0x2c0] sm:$0xf]  ;;  %v3426_v19 = vld [vmem:[#allocation5 + $0x2cc] sm:$0xf0]  ;;  %963 = vmatpush.bf16.msra.mxu3 %v2807_v12  ;;  %vm2269_vm9 = vcmask 1043456  }
  0x1e   :  { %v2790_v20 = vld [vmem:[#allocation5 + $0x3c0] sm:$0xf]  ;;  %v2663_v21 = vor.u32 %v3426_v19, %v2662_v18  ;;  %v3458_v22 = vld [vmem:[#allocation5 + $0x3cc] sm:$0xf0]  ;;  %925 = vmatpush.bf16.msra.mxu0 %v2407_v16 }
  0x1f   :  { %v2390_v23 = vld [vmem:[#allocation5 + $0xa0] sm:$0xf]  ;;  %v3358_v24 = vld [vmem:[#allocation5 + $0xac] sm:$0xf0]  ;;  %v2791_v25 = vor.u32 %v3458_v22, %v2790_v20  ;;  %938 = vmatpush.bf16.msra.mxu1 %v2535_v17 }
  0x20   :  { %v2518_v26 = vld [vmem:[#allocation5 + $0x1a0] sm:$0xf]  ;;  %v3390_v27 = vld [vmem:[#allocation5 + $0x1ac] sm:$0xf0]  ;;  %v2391_v29 = vor.u32 %v3358_v24, %v2390_v23  ;;  %951 = vmatpush.bf16.msra.mxu2 %v2663_v21 }
  0x21   :  { %v2646_v28 = vld [vmem:[#allocation5 + $0x2a0] sm:$0xf]  ;;  %v3422_v30 = vld [vmem:[#allocation5 + $0x2ac] sm:$0xf0]  ;;  %v2519_v33 = vor.u32 %v3390_v27, %v2518_v26  ;;  %964 = vmatpush.bf16.msra.mxu3 %v2791_v25 }
  0x22   :  { %v2774_v31 = vld [vmem:[#allocation5 + $0x3a0] sm:$0xf]  ;;  %v3454_v32 = vld [vmem:[#allocation5 + $0x3ac] sm:$0xf0]  ;;  %v2647_v34 = vor.u32 %v3422_v30, %v2646_v28  ;;  %926 = vmatpush.bf16.msra.mxu0 %v2391_v29  ;;  %v3364_v29 = vld [vmem:[#allocation5 + $0xe4] sm:$0xf] }
  0x23   :  { %v2374_v35 = vld [vmem:[#allocation5 + $0x80] sm:$0xf]  ;;  %v3354_v36 = vld [vmem:[#allocation5 + $0x8c] sm:$0xf0]  ;;  %v2775_v38 = vor.u32 %v3454_v32, %v2774_v31  ;;  %939 = vmatpush.bf16.msra.mxu1 %v2519_v33  ;;  %v2424_v31 = vld [vmem:[#allocation5 + $0xf0] sm:$0xf0] }
  0x24   :  { %v2502_v37 = vld [vmem:[#allocation5 + $0x180] sm:$0xf]  ;;  %v3386_v39 = vld [vmem:[#allocation5 + $0x18c] sm:$0xf0]  ;;  %v2375_v44 = vor.u32 %v3354_v36, %v2374_v35  ;;  %952 = vmatpush.bf16.msra.mxu2 %v2647_v34  ;;  %v3396_v32 = vld [vmem:[#allocation5 + $0x1e4] sm:$0xf] }
  0x25   :  { %v2630_v40 = vld [vmem:[#allocation5 + $0x280] sm:$0xf]  ;;  %v3418_v41 = vld [vmem:[#allocation5 + $0x28c] sm:$0xf0]  ;;  %v2503_v45 = vor.u32 %v3386_v39, %v2502_v37  ;;  %965 = vmatpush.bf16.msra.mxu3 %v2775_v38  ;;  %v98_v34 = vld [vmem:[#allocation2 + $0x8] sm:$0xff] }
  0x26   :  { %v2758_v42 = vld [vmem:[#allocation5 + $0x380] sm:$0xf]  ;;  %v3450_v43 = vld [vmem:[#allocation5 + $0x38c] sm:$0xf0]  ;;  %v2631_v46 = vor.u32 %v3418_v41, %v2630_v40  ;;  %927 = vmatpush.bf16.msra.mxu0 %v2375_v44  ;;  %v2552_v36 = vld [vmem:[#allocation5 + $0x1f0] sm:$0xf0]  ;;  %v245_v40 = vunpack.c.l.b16 %v98_v34 }
  0x27   :  { %v2358_v47 = vld [vmem:[#allocation5 + $0x60] sm:$0xf]  ;;  %v3350_v48 = vld [vmem:[#allocation5 + $0x6c] sm:$0xf0]  ;;  %v2759_v50 = vor.u32 %v3450_v43, %v2758_v42  ;;  %940 = vmatpush.bf16.msra.mxu1 %v2503_v45  ;;  %v3428_v37 = vld [vmem:[#allocation5 + $0x2e4] sm:$0xf]  ;;  %v246_v43 = vunpack.c.h.b16 %v98_v34  ;;  %v2427_v45 = vor.u32 %v3364_v29, %v2424_v31 }
  0x28   :  { %v2486_v49 = vld [vmem:[#allocation5 + $0x160] sm:$0xf]  ;;  %v3382_v51 = vld [vmem:[#allocation5 + $0x16c] sm:$0xf0]  ;;  %v2359_v56 = vor.u32 %v3350_v48, %v2358_v47  ;;  %953 = vmatpush.bf16.msra.mxu2 %v2631_v46  ;;  %v2680_v38 = vld [vmem:[#allocation5 + $0x2f0] sm:$0xf0] }
  0x29   :  { %v2614_v52 = vld [vmem:[#allocation5 + $0x260] sm:$0xf]  ;;  %v3414_v53 = vld [vmem:[#allocation5 + $0x26c] sm:$0xf0]  ;;  %v2487_v57 = vor.u32 %v3382_v51, %v2486_v49  ;;  %966 = vmatpush.bf16.msra.mxu3 %v2759_v50  ;;  %v3360_v46 = vld [vmem:[#allocation5 + $0xc4] sm:$0xf]  ;;  %v2555_v49 = vor.u32 %v3396_v32, %v2552_v36  ;;  %v2683_v50 = vor.u32 %v3428_v37, %v2680_v38 }
  0x2a   :  { %v2742_v54 = vld [vmem:[#allocation5 + $0x360] sm:$0xf]  ;;  %v3446_v55 = vld [vmem:[#allocation5 + $0x36c] sm:$0xf0]  ;;  %v2615_v58 = vor.u32 %v3414_v53, %v2614_v52  ;;  %928 = vmatpush.bf16.msra.mxu0 %v2359_v56  ;;  %v2408_v47 = vld [vmem:[#allocation5 + $0xd0] sm:$0xf0] }
  0x2b   :  { %v2342_v59 = vld [vmem:[#allocation5 + $0x40] sm:$0xf]  ;;  %v3346_v60 = vld [vmem:[#allocation5 + $0x4c] sm:$0xf0]  ;;  %v2743_v62 = vor.u32 %v3446_v55, %v2742_v54  ;;  %941 = vmatpush.bf16.msra.mxu1 %v2487_v57  ;;  %v3392_v51 = vld [vmem:[#allocation5 + $0x1c4] sm:$0xf] }
  0x2c   :  { %v2470_v61 = vld [vmem:[#allocation5 + $0x140] sm:$0xf]  ;;  %v3378_v63 = vld [vmem:[#allocation5 + $0x14c] sm:$0xf0]  ;;  %v2343_v4 = vor.u32 %v3346_v60, %v2342_v59  ;;  %954 = vmatpush.bf16.msra.mxu2 %v2615_v58  ;;  %v3460_v52 = vld [vmem:[#allocation5 + $0x3e4] sm:$0xf]  ;;  %v3846_v58 = vpack.c.b16 %v245_v40, %v245_v40  ;;  %v3849_v60 = vpack.c.b16 %v246_v43, %v246_v43 }
  0x2d   :  { %v2598_v0 = vld [vmem:[#allocation5 + $0x240] sm:$0xf]  ;;  %v3410_v1 = vld [vmem:[#allocation5 + $0x24c] sm:$0xf0]  ;;  %v2471_v6 = vor.u32 %v3378_v63, %v2470_v61  ;;  %967 = vmatpush.bf16.msra.mxu3 %v2743_v62  ;;  %v2808_v53 = vld [vmem:[#allocation5 + $0x3f0] sm:$0xf0]  ;;  %v2411_v61 = vor.u32 %v3360_v46, %v2408_v47 }
  0x2e   :  { %v2726_v2 = vld [vmem:[#allocation5 + $0x340] sm:$0xf]  ;;  %v3442_v3 = vld [vmem:[#allocation5 + $0x34c] sm:$0xf0]  ;;  %v2599_v7 = vor.u32 %v3410_v1, %v2598_v0  ;;  %929 = vmatpush.bf16.msra.mxu0 %v2343_v4  ;;  %v2536_v55 = vld [vmem:[#allocation5 + $0x1d0] sm:$0xf0]  ;;  %v2811_v63 = vor.u32 %v3460_v52, %v2808_v53 }
  0x2f   :  { %v2326_v5 = vld [vmem:[#allocation5 + $0x20] sm:$0xf]  ;;  %v3342_v8 = vld [vmem:[#allocation5 + $0x2c] sm:$0xf0]  ;;  %v2727_v11 = vor.u32 %v3442_v3, %v2726_v2  ;;  %942 = vmatpush.bf16.msra.mxu1 %v2471_v6  ;;  %v3424_v56 = vld [vmem:[#allocation5 + $0x2c4] sm:$0xf]  ;;  %v2539_v2 = vor.u32 %v3392_v51, %v2536_v55 }
  0x30   :  { %v2454_v9 = vld [vmem:[#allocation5 + $0x120] sm:$0xf]  ;;  %v3374_v10 = vld [vmem:[#allocation5 + $0x12c] sm:$0xf0]  ;;  %v2327_v18 = vor.u32 %v3342_v8, %v2326_v5  ;;  %955 = vmatpush.bf16.msra.mxu2 %v2599_v7  ;;  %v2664_v57 = vld [vmem:[#allocation5 + $0x2d0] sm:$0xf0] }
  0x31   :  { %v2582_v12 = vld [vmem:[#allocation5 + $0x220] sm:$0xf]  ;;  %v3406_v13 = vld [vmem:[#allocation5 + $0x22c] sm:$0xf0]  ;;  %v2455_v22 = vor.u32 %v3374_v10, %v2454_v9  ;;  %968 = vmatpush.bf16.msra.mxu3 %v2727_v11  ;;  %v3356_v0 = vld [vmem:[#allocation5 + $0xa4] sm:$0xf]  ;;  %v2667_v3 = vor.u32 %v3424_v56, %v2664_v57 }
  0x32   :  { %v2710_v14 = vld [vmem:[#allocation5 + $0x320] sm:$0xf]  ;;  %v3438_v15 = vld [vmem:[#allocation5 + $0x32c] sm:$0xf0]  ;;  %v2583_v23 = vor.u32 %v3406_v13, %v2582_v12  ;;  %930 = vmatpush.bf16.msra.mxu0 %v2327_v18  ;;  %v2392_v1 = vld [vmem:[#allocation5 + $0xb0] sm:$0xf0] }
  0x33   :  { %v2310_v16 = vld [vmem:[#allocation5] sm:$0xf]  ;;  %v3338_v17 = vld [vmem:[#allocation5 + $0xc] sm:$0xf0]  ;;  %v2711_v27 = vor.u32 %v3438_v15, %v2710_v14  ;;  %943 = vmatpush.bf16.msra.mxu1 %v2455_v22  ;;  %v3388_v4 = vld [vmem:[#allocation5 + $0x1a4] sm:$0xf]  ;;  %v2395_v11 = vor.u32 %v3356_v0, %v2392_v1 }
  0x34   :  { %v2438_v19 = vld [vmem:[#allocation5 + $0x100] sm:$0xf]  ;;  %v3370_v20 = vld [vmem:[#allocation5 + $0x10c] sm:$0xf0]  ;;  %v2311_v35 = vor.u32 %v3338_v17, %v2310_v16  ;;  %956 = vmatpush.bf16.msra.mxu2 %v2583_v23  ;;  %v3456_v5 = vld [vmem:[#allocation5 + $0x3c4] sm:$0xf] }
  0x35   :  { %v2566_v21 = vld [vmem:[#allocation5 + $0x200] sm:$0xf]  ;;  %v3402_v24 = vld [vmem:[#allocation5 + $0x20c] sm:$0xf0]  ;;  %v2439_v41 = vor.u32 %v3370_v20, %v2438_v19  ;;  %969 = vmatpush.bf16.msra.mxu3 %v2711_v27  ;;  %v2792_v6 = vld [vmem:[#allocation5 + $0x3d0] sm:$0xf0] }
  0x36   :  { %v2694_v25 = vld [vmem:[#allocation5 + $0x300] sm:$0xf]  ;;  %v3838_v26 = vld [vmem:[#allocation2] sm:$0xff]  ;;  %v2567_v42 = vor.u32 %v3402_v24, %v2566_v21  ;;  %931 = vmatpush.bf16.msra.mxu0 %v2311_v35  ;;  %v2520_v7 = vld [vmem:[#allocation5 + $0x1b0] sm:$0xf0]  ;;  %v2795_v12 = vor.u32 %v3456_v5, %v2792_v6 }
  0x37   :  { %v3434_v28 = vld [vmem:[#allocation5 + $0x30c] sm:$0xf0]  ;;  %v3840_v30 = vld [vmem:[#allocation5 + $0x400] sm:$0x11]  ;;  %v243_v39 = vunpack.c.l.b16 %v3838_v26  ;;  %v244_v59 = vunpack.c.h.b16 %v3838_v26  ;;  %944 = vmatpush.bf16.msra.mxu1 %v2439_v41  ;;  %v2648_v9 = vld [vmem:[#allocation5 + $0x2b0] sm:$0xf0]  ;;  %v2523_v15 = vor.u32 %v3388_v4, %v2520_v7 }
  0x38   :  { %v643_v33 = vunpack.c.l.b16 %v3840_v30  ;;  %v2695_v44 = vor.u32 %v3434_v28, %v2694_v25  ;;  %957 = vmatpush.bf16.msra.mxu2 %v2567_v42  ;;  %v3420_v8 = vld [vmem:[#allocation5 + $0x2a4] sm:$0xf]  ;;  %v2376_v14 = vld [vmem:[#allocation5 + $0x90] sm:$0xf0]  ;;  %v99_v23 = vld [vmem:[#allocation2 + $0x10] sm:$0xf] }
  0x39   :  { %v3844_v54 = vpack.c.b16 %v243_v39, %v243_v39  ;;  %v3854_v10 = vpack.c.b16 %v244_v59, %v244_v59  ;;  %v3352_v13 = vld [vmem:[#allocation5 + $0x84] sm:$0xf]  ;;  %v2651_v16 = vor.u32 %v3420_v8, %v2648_v9  ;;  %v2776_v19 = vld [vmem:[#allocation5 + $0x3b0] sm:$0xf0]  ;;  %v247_v37 = vunpack.c.l.b16 %v99_v23 }
  0x3a   :  { %v775_v48 = vpack.c.b16 %v643_v33, %v643_v33  ;;  %970 = vmatpush.bf16.msra.mxu3 %v2695_v44  ;;  %v3384_v17 = vld [vmem:[#allocation5 + $0x184] sm:$0xf]  ;;  %v2504_v20 = vld [vmem:[#allocation5 + $0x190] sm:$0xf0]  ;;  %v2379_v24 = vor.u32 %v3352_v13, %v2376_v14 }
  0x3b   :  { %989 = vmatpush.bf16.msrb.mxu1 %v2427_v45  ;;  %932 = vmatmul.bf16.vlgmr.msra.gmra.mxu0 %v3844_v54  ;;  %v3452_v18 = vld [vmem:[#allocation5 + $0x3a4] sm:$0xf]  ;;  %v2632_v22 = vld [vmem:[#allocation5 + $0x290] sm:$0xf0]  ;;  %v2507_v28 = vor.u32 %v3384_v17, %v2504_v20  ;;  %v3858_v47 = vpack.c.b16 %v247_v37, %v247_v37  ;;  %v2558_v17 = vld [vmem:[#allocation5 + $0x1e8] sm:$0xf] }
  0x3c   :  { %v913_v62 = vsel %vm911_vm0, %v775_v48, 0  ;;  %1002 = vmatpush.bf16.msrb.mxu2 %v2555_v49  ;;  %945 = vmatmul.bf16.vlgmr.msra.gmra.mxu1 %v3854_v10  ;;  %v3416_v21 = vld [vmem:[#allocation5 + $0x284] sm:$0xf]  ;;  %v2779_v25 = vor.u32 %v3452_v18, %v2776_v19  ;;  %v2360_v27 = vld [vmem:[#allocation5 + $0x70] sm:$0xf0]  ;;  %v644_v19 = vunpack.c.h.b16 %v3840_v30 }
  0x3d   :  { %958 = vmatmul.bf16.vlgmr.msra.gmra.mxu2 %v3846_v58  ;;  %983 = vmatpush.bf16.msrb.mxu0 %v913_v62  ;;  %v3348_v26 = vld [vmem:[#allocation5 + $0x64] sm:$0xf]  ;;  %v2635_v29 = vor.u32 %v3416_v21, %v2632_v22  ;;  %v2760_v33 = vld [vmem:[#allocation5 + $0x390] sm:$0xf0]  ;;  %v3399_v18 = vld [vmem:[#allocation5 + $0x1f4] sm:$0xf0] }
  0x3e   :  { %1015 = vmatpush.bf16.msrb.mxu3 %v2683_v50  ;;  %v3380_v31 = vld [vmem:[#allocation5 + $0x164] sm:$0xf]  ;;  %v2488_v34 = vld [vmem:[#allocation5 + $0x170] sm:$0xf0]  ;;  %v2363_v38 = vor.u32 %v3348_v26, %v2360_v27  ;;  %v2559_v27 = vor.u32 %v3399_v18, %v2558_v17  ;;  %v2814_v37 = vld [vmem:[#allocation5 + $0x3e8] sm:$0xf] }
  0x3f   :  { %971 = vmatmul.bf16.vlgmr.msra.gmra.mxu3 %v3849_v60  ;;  %990 = vmatpush.bf16.msrb.mxu1 %v2411_v61  ;;  %v3448_v32 = vld [vmem:[#allocation5 + $0x384] sm:$0xf]  ;;  %v2616_v36 = vld [vmem:[#allocation5 + $0x270] sm:$0xf0]  ;;  %v2491_v42 = vor.u32 %v3380_v31, %v2488_v34  ;;  %v3431_v31 = vld [vmem:[#allocation5 + $0x2f4] sm:$0xf0] }
  0x40   :  { %1003 = vmatpush.bf16.msrb.mxu2 %v2539_v2  ;;  %v3412_v35 = vld [vmem:[#allocation5 + $0x264] sm:$0xf]  ;;  %v2763_v39 = vor.u32 %v3448_v32, %v2760_v33  ;;  %v2344_v41 = vld [vmem:[#allocation5 + $0x50] sm:$0xf0]  ;;  %v3363_v32 = vld [vmem:[#allocation5 + $0xd4] sm:$0xf0] }
  0x41   :  { %1028 = vmatpush.bf16.msra.mxu0 %v2811_v63  ;;  %v3344_v40 = vld [vmem:[#allocation5 + $0x44] sm:$0xf]  ;;  %v2619_v43 = vor.u32 %v3412_v35, %v2616_v36  ;;  %v2744_v46 = vld [vmem:[#allocation5 + $0x370] sm:$0xf0]  ;;  %v2542_v33 = vld [vmem:[#allocation5 + $0x1c8] sm:$0xf]  ;;  %v776_v35 = vpack.c.b16 %v644_v19, %v644_v19 }
  0x42   :  { %1016 = vmatpush.bf16.msrb.mxu3 %v2667_v3  ;;  %v3376_v44 = vld [vmem:[#allocation5 + $0x144] sm:$0xf]  ;;  %v2472_v48 = vld [vmem:[#allocation5 + $0x150] sm:$0xf0]  ;;  %v2347_v51 = vor.u32 %v3344_v40, %v2344_v41  ;;  %v3395_v34 = vld [vmem:[#allocation5 + $0x1d4] sm:$0xf0] }
  0x43   :  { %991 = vmatpush.bf16.msrb.mxu1 %v2395_v11  ;;  %v3444_v45 = vld [vmem:[#allocation5 + $0x364] sm:$0xf]  ;;  %v2600_v50 = vld [vmem:[#allocation5 + $0x250] sm:$0xf0]  ;;  %v2475_v56 = vor.u32 %v3376_v44, %v2472_v48  ;;  %v2543_v40 = vor.u32 %v3395_v34, %v2542_v33  ;;  %v2398_v41 = vld [vmem:[#allocation5 + $0xa8] sm:$0xf] }
  0x44   :  { %1004 = vmatpush.bf16.msrb.mxu2 %v2523_v15  ;;  %v3408_v49 = vld [vmem:[#allocation5 + $0x244] sm:$0xf]  ;;  %v2747_v52 = vor.u32 %v3444_v45, %v2744_v46  ;;  %v2328_v55 = vld [vmem:[#allocation5 + $0x30] sm:$0xf0]  ;;  %v2430_v15 = vld [vmem:[#allocation5 + $0xe8] sm:$0xf] }
  0x45   :  { %1029 = vmatpush.bf16.msra.mxu0 %v2795_v12  ;;  %v3340_v53 = vld [vmem:[#allocation5 + $0x24] sm:$0xf]  ;;  %v2603_v57 = vor.u32 %v3408_v49, %v2600_v50  ;;  %v2728_v62 = vld [vmem:[#allocation5 + $0x350] sm:$0xf0]  ;;  %v3359_v44 = vld [vmem:[#allocation5 + $0xb4] sm:$0xf0] }
  0x46   :  { %1017 = vmatpush.bf16.msrb.mxu3 %v2651_v16  ;;  %v3372_v59 = vld [vmem:[#allocation5 + $0x124] sm:$0xf]  ;;  %v2456_v63 = vld [vmem:[#allocation5 + $0x130] sm:$0xf0]  ;;  %v2331_v2 = vor.u32 %v3340_v53, %v2328_v55  ;;  %v3367_v16 = vld [vmem:[#allocation5 + $0xf4] sm:$0xf0]  ;;  %v2399_v53 = vor.u32 %v3359_v44, %v2398_v41 }
  0x47   :  { %992 = vmatpush.bf16.msrb.mxu1 %v2379_v24  ;;  %v3440_v61 = vld [vmem:[#allocation5 + $0x344] sm:$0xf]  ;;  %v2584_v1 = vld [vmem:[#allocation5 + $0x230] sm:$0xf0]  ;;  %v2459_v7 = vor.u32 %v3372_v59, %v2456_v63  ;;  %v2431_v26 = vor.u32 %v3367_v16, %v2430_v15  ;;  %v2526_v45 = vld [vmem:[#allocation5 + $0x1a8] sm:$0xf] }
  0x48   :  { %1005 = vmatpush.bf16.msrb.mxu2 %v2507_v28  ;;  %v3404_v0 = vld [vmem:[#allocation5 + $0x224] sm:$0xf]  ;;  %v2731_v3 = vor.u32 %v3440_v61, %v2728_v62  ;;  %v2312_v5 = vld [vmem:[#allocation5 + $0x10] sm:$0xf0]  ;;  %v2414_v28 = vld [vmem:[#allocation5 + $0xc8] sm:$0xf] }
  0x49   :  { %1030 = vmatpush.bf16.msra.mxu0 %v2779_v25  ;;  %v3336_v4 = vld [vmem:[#allocation5 + $0x4] sm:$0xf]  ;;  %v2587_v8 = vor.u32 %v3404_v0, %v2584_v1  ;;  %v2440_v9 = vld [vmem:[#allocation5 + $0x110] sm:$0xf0]  ;;  %v3391_v46 = vld [vmem:[#allocation5 + $0x1b4] sm:$0xf0] }
  0x4a   :  { %1018 = vmatpush.bf16.msrb.mxu3 %v2635_v29  ;;  %v3368_v6 = vld [vmem:[#allocation5 + $0x104] sm:$0xf]  ;;  %v2712_v12 = vld [vmem:[#allocation5 + $0x330] sm:$0xf0]  ;;  %v2315_v20 = vor.u32 %v3336_v4, %v2312_v5  ;;  %v2686_v29 = vld [vmem:[#allocation5 + $0x2e8] sm:$0xf]  ;;  %v2527_v55 = vor.u32 %v3391_v46, %v2526_v45 }
  0x4b   :  { %993 = vmatpush.bf16.msrb.mxu1 %v2363_v38  ;;  %2820 = vmatmul.msk.bf16.vlgmr.msrb.gmra.mxu0 %vm907_vm1, %v3858_v47  ;;  %v3436_v11 = vld [vmem:[#allocation5 + $0x324] sm:$0xf]  ;;  %v2568_v14 = vld [vmem:[#allocation5 + $0x210] sm:$0xf0]  ;;  %v2443_v22 = vor.u32 %v3368_v6, %v2440_v9  ;;  %v2687_v36 = vor.u32 %v3431_v31, %v2686_v29  ;;  %v3463_v38 = vld [vmem:[#allocation5 + $0x3f4] sm:$0xf0] }
  0x4c   :  { %1006 = vmatpush.bf16.msrb.mxu2 %v2491_v42  ;;  %v3400_v13 = vld [vmem:[#allocation5 + $0x204] sm:$0xf]  ;;  %v2715_v21 = vor.u32 %v3436_v11, %v2712_v12  ;;  %v2696_v25 = vld [vmem:[#allocation5 + $0x310] sm:$0xf0]  ;;  %v2670_v42 = vld [vmem:[#allocation5 + $0x2c8] sm:$0xf]  ;;  %v2815_v49 = vor.u32 %v3463_v38, %v2814_v37 }
  0x4d   :  { %1031 = vmatpush.bf16.msra.mxu0 %v2763_v39  ;;  %v2571_v23 = vor.u32 %v3400_v13, %v2568_v14  ;;  %v3432_v24 = vld [vmem:[#allocation5 + $0x304] sm:$0xf]  ;;  %v2415_v39 = vor.u32 %v3363_v32, %v2414_v28  ;;  %v916_v48 = vsel %vm911_vm0, %v776_v35, 0  ;;  %v3423_v59 = vld [vmem:[#allocation5 + $0x2b4] sm:$0xf0] }
  0x4e   :  { %1019 = vmatpush.bf16.msrb.mxu3 %v2619_v43  ;;  %v2699_v30 = vor.u32 %v3432_v24, %v2696_v25  ;;  %v3427_v43 = vld [vmem:[#allocation5 + $0x2d4] sm:$0xf0]  ;;  %v2510_v62 = vld [vmem:[#allocation5 + $0x188] sm:$0xf] }
  0x4f   :  { %994 = vmatpush.bf16.msrb.mxu1 %v2347_v51  ;;  %v2671_v50 = vor.u32 %v3427_v43, %v2670_v42  ;;  %v2798_v51 = vld [vmem:[#allocation5 + $0x3c8] sm:$0xf]  ;;  %v3355_v61 = vld [vmem:[#allocation5 + $0x94] sm:$0xf0] }
  0x50   :  { %1007 = vmatpush.bf16.msrb.mxu2 %v2475_v56  ;;  %v2382_v56 = vld [vmem:[#allocation5 + $0x88] sm:$0xf]  ;;  %v3387_v63 = vld [vmem:[#allocation5 + $0x194] sm:$0xf0] }
  0x51   :  { %1032 = vmatpush.bf16.msra.mxu0 %v2747_v52  ;;  %v3459_v52 = vld [vmem:[#allocation5 + $0x3d4] sm:$0xf0]  ;;  %v2383_v4 = vor.u32 %v3355_v61, %v2382_v56  ;;  %v2511_v5 = vor.u32 %v3387_v63, %v2510_v62  ;;  %v2366_v6 = vld [vmem:[#allocation5 + $0x68] sm:$0xf] }
  0x52   :  { %1020 = vmatpush.bf16.msrb.mxu3 %v2603_v57  ;;  %v2654_v57 = vld [vmem:[#allocation5 + $0x2a8] sm:$0xf]  ;;  %v2799_v0 = vor.u32 %v3459_v52, %v2798_v51  ;;  %v3351_v9 = vld [vmem:[#allocation5 + $0x74] sm:$0xf0]  ;;  %v3365_v52 = vld [vmem:[#allocation5 + $0xec] sm:$0xf] }
  0x53   :  { %995 = vmatpush.bf16.msrb.mxu1 %v2331_v2  ;;  %v2655_v1 = vor.u32 %v3423_v59, %v2654_v57  ;;  %v2782_v2 = vld [vmem:[#allocation5 + $0x3a8] sm:$0xf]  ;;  %v3383_v12 = vld [vmem:[#allocation5 + $0x174] sm:$0xf0]  ;;  %v2367_v17 = vor.u32 %v3351_v9, %v2366_v6  ;;  %v2816_v6 = vld [vmem:[#allocation5 + $0x3f8] sm:$0xf0] }
  0x54   :  { %1008 = vmatpush.bf16.msrb.mxu2 %v2459_v7  ;;  %v2638_v7 = vld [vmem:[#allocation5 + $0x288] sm:$0xf]  ;;  %v3451_v16 = vld [vmem:[#allocation5 + $0x394] sm:$0xf0] }
  0x55   :  { %1033 = vmatpush.bf16.msra.mxu0 %v2731_v3  ;;  %v3455_v3 = vld [vmem:[#allocation5 + $0x3b4] sm:$0xf0]  ;;  %v2494_v11 = vld [vmem:[#allocation5 + $0x168] sm:$0xf] }
  0x56   :  { %1021 = vmatpush.bf16.msrb.mxu3 %v2587_v8  ;;  %v3419_v8 = vld [vmem:[#allocation5 + $0x294] sm:$0xf0]  ;;  %v2783_v13 = vor.u32 %v3455_v3, %v2782_v2  ;;  %v2766_v15 = vld [vmem:[#allocation5 + $0x388] sm:$0xf]  ;;  %v2495_v18 = vor.u32 %v3383_v12, %v2494_v11  ;;  %v3397_v2 = vld [vmem:[#allocation5 + $0x1ec] sm:$0xf] }
  0x57   :  { %996 = vmatpush.bf16.msrb.mxu1 %v2315_v20  ;;  %v2639_v14 = vor.u32 %v3419_v8, %v2638_v7  ;;  %v2350_v19 = vld [vmem:[#allocation5 + $0x48] sm:$0xf]  ;;  %v3379_v24 = vld [vmem:[#allocation5 + $0x154] sm:$0xf0]  ;;  %v2767_v25 = vor.u32 %v3451_v16, %v2766_v15  ;;  %v3361_v7 = vld [vmem:[#allocation5 + $0xcc] sm:$0xf] }
  0x58   :  { %1009 = vmatpush.bf16.msrb.mxu2 %v2443_v22  ;;  %v2622_v20 = vld [vmem:[#allocation5 + $0x268] sm:$0xf]  ;;  %v3347_v22 = vld [vmem:[#allocation5 + $0x54] sm:$0xf0]  ;;  %v2416_v8 = vld [vmem:[#allocation5 + $0xd8] sm:$0xf0] }
  0x59   :  { %1034 = vmatpush.bf16.msra.mxu0 %v2715_v21  ;;  %v3415_v21 = vld [vmem:[#allocation5 + $0x274] sm:$0xf0]  ;;  %v3868_v29 = vld [vmem:[#allocation5 + $0x408] sm:$0x11]  ;;  %v2351_v31 = vor.u32 %v3347_v22, %v2350_v19  ;;  %v2688_v19 = vld [vmem:[#allocation5 + $0x2f8] sm:$0xf0] }
  0x5a   :  { %1022 = vmatpush.bf16.msrb.mxu3 %v2571_v23  ;;  %997 = vmatmul.bf16.vlgmr.msrb.gmra.mxu1 %v3844_v54  ;;  %v2478_v23 = vld [vmem:[#allocation5 + $0x148] sm:$0xf]  ;;  %v3447_v28 = vld [vmem:[#allocation5 + $0x374] sm:$0xf0]  ;;  %v3457_v22 = vld [vmem:[#allocation5 + $0x3cc] sm:$0xf] }
  0x5b   :  { %1010 = vmatmul.bf16.vlgmr.msrb.gmra.mxu2 %v3854_v10  ;;  %1048 = vmatpush.bf16.msra.mxu1 %v916_v48  ;;  %v2479_v32 = vor.u32 %v3379_v24, %v2478_v23  ;;  %v2334_v33 = vld [vmem:[#allocation5 + $0x28] sm:$0xf]  ;;  %v3343_v35 = vld [vmem:[#allocation5 + $0x34] sm:$0xf0]  ;;  %v2800_v23 = vld [vmem:[#allocation5 + $0x3d8] sm:$0xf0] }
  0x5c   :  { %1054 = vmatpush.bf16.msra.mxu2 %v2431_v26  ;;  %v2623_v26 = vor.u32 %v3415_v21, %v2622_v20  ;;  %v2606_v34 = vld [vmem:[#allocation5 + $0x248] sm:$0xf]  ;;  %v3375_v37 = vld [vmem:[#allocation5 + $0x134] sm:$0xf0]  ;;  %v2335_v43 = vor.u32 %v3343_v35, %v2334_v33  ;;  %v2419_v20 = vor.u32 %v3361_v7, %v2416_v8  ;;  %v2544_v21 = vld [vmem:[#allocation5 + $0x1d8] sm:$0xf0] }
  0x5d   :  { %1035 = vmatpush.bf16.msra.mxu0 %v2699_v30  ;;  %1023 = vmatmul.bf16.vlgmr.msrb.gmra.mxu3 %v3846_v58  ;;  %v3411_v30 = vld [vmem:[#allocation5 + $0x254] sm:$0xf0]  ;;  %v2734_v41 = vld [vmem:[#allocation5 + $0x348] sm:$0xf]  ;;  %v3357_v24 = vld [vmem:[#allocation5 + $0xac] sm:$0xf] }
  0x5e   :  { %1067 = vmatpush.bf16.msra.mxu3 %v2559_v27  ;;  %v2750_v27 = vld [vmem:[#allocation5 + $0x368] sm:$0xf]  ;;  %v3443_v42 = vld [vmem:[#allocation5 + $0x354] sm:$0xf0]  ;;  %v3425_v33 = vld [vmem:[#allocation5 + $0x2cc] sm:$0xf] }
  0x5f   :  { %1093 = vmatpush.bf16.msrb.mxu1 %v2815_v49  ;;  %v2751_v38 = vor.u32 %v3447_v28, %v2750_v27  ;;  %v2318_v45 = vld [vmem:[#allocation5 + $0x8] sm:$0xf]  ;;  %v3407_v48 = vld [vmem:[#allocation5 + $0x234] sm:$0xf0]  ;;  %v2528_v35 = vld [vmem:[#allocation5 + $0x1b8] sm:$0xf0] }
  0x60   :  { %1055 = vmatpush.bf16.msra.mxu2 %v2415_v39  ;;  %1036 = vmatmul.bf16.vlgmr.msra.gmra.mxu0 %v3849_v60  ;;  %v645_v39 = vunpack.c.l.b16 %v3868_v29  ;;  %v2590_v46 = vld [vmem:[#allocation5 + $0x228] sm:$0xf]  ;;  %v3339_v49 = vld [vmem:[#allocation5 + $0x14] sm:$0xf0]  ;;  %v3377_v7 = vld [vmem:[#allocation5 + $0x14c] sm:$0xf] }
  0x61   :  { %1080 = vmatpush.bf16.msrb.mxu0 %v2687_v36  ;;  %v2462_v36 = vld [vmem:[#allocation5 + $0x128] sm:$0xf]  ;;  %v3371_v51 = vld [vmem:[#allocation5 + $0x114] sm:$0xf0]  ;;  %v2591_v57 = vor.u32 %v3407_v48, %v2590_v46  ;;  %v2319_v62 = vor.u32 %v3339_v49, %v2318_v45  ;;  %v2656_v45 = vld [vmem:[#allocation5 + $0x2b8] sm:$0xf0] }
  0x62   :  { %1068 = vmatpush.bf16.msra.mxu3 %v2543_v40  ;;  %v2607_v40 = vor.u32 %v3411_v30, %v2606_v34  ;;  %v2463_v44 = vor.u32 %v3375_v37, %v2462_v36  ;;  %v777_v56 = vpack.c.b16 %v645_v39, %v645_v39  ;;  %v2718_v59 = vld [vmem:[#allocation5 + $0x328] sm:$0xf]  ;;  %v3439_v61 = vld [vmem:[#allocation5 + $0x334] sm:$0xf0]  ;;  %v2672_v34 = vld [vmem:[#allocation5 + $0x2d8] sm:$0xf0] }
  0x63   :  { %1094 = vmatpush.bf16.msrb.mxu1 %v2799_v0  ;;  %v2574_v0 = vld [vmem:[#allocation5 + $0x208] sm:$0xf]  ;;  %v2719_v9 = vor.u32 %v3439_v61, %v2718_v59  ;;  %v3453_v36 = vld [vmem:[#allocation5 + $0x3ac] sm:$0xf]  ;;  %v2784_v37 = vld [vmem:[#allocation5 + $0x3b8] sm:$0xf0] }
  0x64   :  { %1056 = vmatpush.bf16.msra.mxu2 %v2399_v53  ;;  %v2432_v53 = vld [vmem:[#allocation5 + $0xf8] sm:$0xf0]  ;;  %v919_v11 = vsel %vm911_vm0, %v777_v56, 0  ;;  %v3449_v49 = vld [vmem:[#allocation5 + $0x38c] sm:$0xf] }
  0x65   :  { %1081 = vmatpush.bf16.msrb.mxu0 %v2671_v50  ;;  %v2446_v50 = vld [vmem:[#allocation5 + $0x108] sm:$0xf]  ;;  %v2435_v3 = vor.u32 %v3365_v52, %v2432_v53  ;;  %v2384_v39 = vld [vmem:[#allocation5 + $0x98] sm:$0xf0]  ;;  %v3417_v59 = vld [vmem:[#allocation5 + $0x28c] sm:$0xf] }
  0x66   :  { %1069 = vmatpush.bf16.msra.mxu3 %v2527_v55  ;;  %v2735_v55 = vor.u32 %v3443_v42, %v2734_v41  ;;  %v2447_v63 = vor.u32 %v3371_v51, %v2446_v50  ;;  %v2787_v42 = vor.u32 %v3453_v36, %v2784_v37  ;;  %v2512_v48 = vld [vmem:[#allocation5 + $0x198] sm:$0xf0]  ;;  %v3349_v51 = vld [vmem:[#allocation5 + $0x6c] sm:$0xf] }
  0x67   :  { %1095 = vmatpush.bf16.msrb.mxu1 %v2783_v13  ;;  %v2702_v13 = vld [vmem:[#allocation5 + $0x308] sm:$0xf]  ;;  %v2768_v50 = vld [vmem:[#allocation5 + $0x398] sm:$0xf0]  ;;  %v3413_v8 = vld [vmem:[#allocation5 + $0x26c] sm:$0xf] }
  0x68   :  { %1057 = vmatpush.bf16.msra.mxu2 %v2383_v4  ;;  %v2560_v4 = vld [vmem:[#allocation5 + $0x1f8] sm:$0xf0]  ;;  %v2771_v56 = vor.u32 %v3449_v49, %v2768_v50  ;;  %v3369_v37 = vld [vmem:[#allocation5 + $0x10c] sm:$0xf] }
  0x69   :  { %1082 = vmatpush.bf16.msrb.mxu0 %v2655_v1  ;;  %v3403_v1 = vld [vmem:[#allocation5 + $0x214] sm:$0xf0]  ;;  %v2563_v15 = vor.u32 %v3397_v2, %v2560_v4  ;;  %v2368_v52 = vld [vmem:[#allocation5 + $0x78] sm:$0xf0]  ;;  %v3345_v2 = vld [vmem:[#allocation5 + $0x4c] sm:$0xf] }
  0x6a   :  { %1070 = vmatpush.bf16.msra.mxu3 %v2511_v5  ;;  %2821 = vmatmul.msk.bf16.vlgmr.msra.gmra.mxu1 %vm907_vm1, %v3858_v47  ;;  %v3461_v5 = vld [vmem:[#allocation5 + $0x3ec] sm:$0xf]  ;;  %v2575_v12 = vor.u32 %v3403_v1, %v2574_v0  ;;  %v2640_v61 = vld [vmem:[#allocation5 + $0x298] sm:$0xf0] }
  0x6b   :  { %1096 = vmatpush.bf16.msrb.mxu1 %v2767_v25  ;;  %v2819_v16 = vor.u32 %v3461_v5, %v2816_v6  ;;  %v2400_v25 = vld [vmem:[#allocation5 + $0xb8] sm:$0xf0]  ;;  %v3445_v0 = vld [vmem:[#allocation5 + $0x36c] sm:$0xf]  ;;  %v2643_v4 = vor.u32 %v3417_v59, %v2640_v61  ;;  %v3050_v61 = vld [vmem:[#allocation8 + $0x1c0] sm:$0xf] }
  0x6c   :  { %1058 = vmatpush.bf16.msra.mxu2 %v2367_v17  ;;  %v3393_v17 = vld [vmem:[#allocation5 + $0x1cc] sm:$0xf]  ;;  %v2403_v30 = vor.u32 %v3357_v24, %v2400_v25  ;;  %v2752_v1 = vld [vmem:[#allocation5 + $0x378] sm:$0xf0] }
  0x6d   :  { %1083 = vmatpush.bf16.msrb.mxu0 %v2639_v14  ;;  %v3435_v14 = vld [vmem:[#allocation5 + $0x314] sm:$0xf0]  ;;  %v2547_v28 = vor.u32 %v3393_v17, %v2544_v21  ;;  %v2755_v6 = vor.u32 %v3445_v0, %v2752_v1  ;;  %v3373_v21 = vld [vmem:[#allocation5 + $0x12c] sm:$0xf]  ;;  %v2464_v25 = vld [vmem:[#allocation5 + $0x138] sm:$0xf0] }
  0x6e   :  { %1071 = vmatpush.bf16.msra.mxu3 %v2495_v18  ;;  %v3429_v18 = vld [vmem:[#allocation5 + $0x2ec] sm:$0xf]  ;;  %v3486_v0 = vld [vmem:[#allocation8 + $0xac] sm:$0xf0] }
  0x6f   :  { %1097 = vmatpush.bf16.msrb.mxu1 %v2751_v38  ;;  %v2691_v27 = vor.u32 %v3429_v18, %v2688_v19  ;;  %v3353_v38 = vld [vmem:[#allocation5 + $0x8c] sm:$0xf]  ;;  %v646_v18 = vunpack.c.h.b16 %v3868_v29  ;;  %v2467_v29 = vor.u32 %v3373_v21, %v2464_v25  ;;  %v3470_v21 = vld [vmem:[#allocation8 + $0x2c] sm:$0xf0] }
  0x70   :  { %1059 = vmatpush.bf16.msra.mxu2 %v2351_v31  ;;  %v2803_v31 = vor.u32 %v3457_v22, %v2800_v23  ;;  %v2387_v46 = vor.u32 %v3353_v38, %v2384_v39  ;;  %v3409_v22 = vld [vmem:[#allocation5 + $0x24c] sm:$0xf]  ;;  %v2608_v23 = vld [vmem:[#allocation5 + $0x258] sm:$0xf0]  ;;  %v3466_v25 = vld [vmem:[#allocation8 + $0xc] sm:$0xf0] }
  0x71   :  { %1084 = vmatpush.bf16.msrb.mxu0 %v2623_v26  ;;  %v2703_v26 = vor.u32 %v3435_v14, %v2702_v13  ;;  %v3441_v13 = vld [vmem:[#allocation5 + $0x34c] sm:$0xf]  ;;  %v2736_v14 = vld [vmem:[#allocation5 + $0x358] sm:$0xf0] }
  0x72   :  { %1072 = vmatpush.bf16.msra.mxu3 %v2479_v32  ;;  %v3389_v32 = vld [vmem:[#allocation5 + $0x1ac] sm:$0xf]  ;;  %v2448_v38 = vld [vmem:[#allocation5 + $0x118] sm:$0xf0] }
  0x73   :  { %1098 = vmatpush.bf16.msrb.mxu1 %v2735_v55  ;;  %v2531_v41 = vor.u32 %v3389_v32, %v2528_v35  ;;  %v2611_v32 = vor.u32 %v3409_v22, %v2608_v23  ;;  %v2592_v35 = vld [vmem:[#allocation5 + $0x238] sm:$0xf0]  ;;  %v3433_v39 = vld [vmem:[#allocation5 + $0x30c] sm:$0xf] }
  0x74   :  { %1060 = vmatpush.bf16.msra.mxu2 %v2335_v43  ;;  %v3385_v43 = vld [vmem:[#allocation5 + $0x18c] sm:$0xf] }
  0x75   :  { %1085 = vmatpush.bf16.msrb.mxu0 %v2607_v40  ;;  %v2675_v40 = vor.u32 %v3425_v33, %v2672_v34  ;;  %v2515_v55 = vor.u32 %v3385_v43, %v2512_v48  ;;  %v778_v33 = vpack.c.b16 %v646_v18, %v646_v18  ;;  %v2576_v48 = vld [vmem:[#allocation5 + $0x218] sm:$0xf0]  ;;  %v2986_v18 = vld [vmem:[#allocation8 + $0x140] sm:$0xf] }
  0x76   :  { %1073 = vmatpush.bf16.msra.mxu3 %v2463_v44  ;;  %v3421_v44 = vld [vmem:[#allocation5 + $0x2ac] sm:$0xf] }
  0x77   :  { %1099 = vmatpush.bf16.msrb.mxu1 %v2719_v9  ;;  %v2659_v53 = vor.u32 %v3421_v44, %v2656_v45  ;;  %v2624_v9 = vld [vmem:[#allocation5 + $0x278] sm:$0xf0]  ;;  %v922_v44 = vsel %vm911_vm0, %v778_v33, 0  ;;  %v2451_v45 = vor.u32 %v3369_v37, %v2448_v38  ;;  %v3068_v37 = vld [vmem:[#allocation8 + $0x1f0] sm:$0xf0] }
  0x78   :  { %1061 = vmatpush.bf16.msra.mxu2 %v2319_v62  ;;  %v2371_v62 = vor.u32 %v3349_v51, %v2368_v52  ;;  %v2627_v17 = vor.u32 %v3413_v8, %v2624_v9  ;;  %v3066_v51 = vld [vmem:[#allocation8 + $0x1e0] sm:$0xf]  ;;  %v3526_v52 = vld [vmem:[#allocation8 + $0x1ec] sm:$0xf0] }
  0x79   :  { %1086 = vmatpush.bf16.msrb.mxu0 %v2591_v57  ;;  %v3381_v57 = vld [vmem:[#allocation5 + $0x16c] sm:$0xf]  ;;  %v3018_v8 = vld [vmem:[#allocation8 + $0x180] sm:$0xf]  ;;  %v3514_v9 = vld [vmem:[#allocation8 + $0x18c] sm:$0xf0] }
  0x7a   :  { %1074 = vmatpush.bf16.msra.mxu3 %v2447_v63  ;;  %v2496_v63 = vld [vmem:[#allocation5 + $0x178] sm:$0xf0] }
  0x7b   :  { %1062 = vmatmul.bf16.vlgmr.msra.gmra.mxu2 %v3844_v54  ;;  %1100 = vmatpush.bf16.msrb.mxu1 %v2703_v26  ;;  %v2499_v5 = vor.u32 %v3381_v57, %v2496_v63  ;;  %v3437_v26 = vld [vmem:[#allocation5 + $0x32c] sm:$0xf]  ;;  %v3067_v57 = vor.u32 %v3526_v52, %v3066_v51  ;;  %v2906_v63 = vld [vmem:[#allocation8 + $0xa0] sm:$0xf]  ;;  %v3480_v52 = vld [vmem:[#allocation8 + $0x84] sm:$0xf] }
  0x7c   :  { %1113 = vmatpush.bf16.msrb.mxu2 %v919_v11 }
  0x7d   :  { %1087 = vmatpush.bf16.msrb.mxu0 %v2575_v12  ;;  %1075 = vmatmul.bf16.vlgmr.msra.gmra.mxu3 %v3854_v10  ;;  %v2480_v12 = vld [vmem:[#allocation5 + $0x158] sm:$0xf0] }
  0x7e   :  { %1119 = vmatpush.bf16.msrb.mxu3 %v2435_v3  ;;  %1101 = vmatmul.bf16.vlgmr.msrb.gmra.mxu1 %v3849_v60  ;;  %v2352_v3 = vld [vmem:[#allocation5 + $0x58] sm:$0xf0]  ;;  %v2483_v19 = vor.u32 %v3377_v7, %v2480_v12 }
  0x7f   :  { %1145 = vmatpush.bf16.msra.mxu1 %v2691_v27  ;;  %v2355_v11 = vor.u32 %v3345_v2, %v2352_v3  ;;  %v2720_v27 = vld [vmem:[#allocation5 + $0x338] sm:$0xf0]  ;;  %v2907_v2 = vor.u32 %v3486_v0, %v2906_v63  ;;  %v2890_v3 = vld [vmem:[#allocation8 + $0x80] sm:$0xf]  ;;  %v3554_v63 = vld [vmem:[#allocation8 + $0x2cc] sm:$0xf0] }
  0x80   :  { %1158 = vmatpush.bf16.msra.mxu2 %v2819_v16  ;;  %1088 = vmatmul.bf16.vlgmr.msrb.gmra.mxu0 %v3846_v58  ;;  %v2336_v16 = vld [vmem:[#allocation5 + $0x38] sm:$0xf0]  ;;  %v2723_v34 = vor.u32 %v3437_v26, %v2720_v27  ;;  %v2970_v26 = vld [vmem:[#allocation8 + $0x120] sm:$0xf]  ;;  %v3502_v27 = vld [vmem:[#allocation8 + $0x12c] sm:$0xf0] }
  0x81   :  { %1132 = vmatpush.bf16.msra.mxu0 %v2563_v15  ;;  %v3341_v15 = vld [vmem:[#allocation5 + $0x2c] sm:$0xf] }
  0x82   :  { %1120 = vmatpush.bf16.msrb.mxu3 %v2419_v20  ;;  %v2739_v20 = vor.u32 %v3441_v13, %v2736_v14  ;;  %v2339_v24 = vor.u32 %v3341_v15, %v2336_v16  ;;  %v3002_v13 = vld [vmem:[#allocation8 + $0x160] sm:$0xf]  ;;  %v3510_v14 = vld [vmem:[#allocation8 + $0x16c] sm:$0xf0] }
  0x83   :  { %1146 = vmatpush.bf16.msra.mxu1 %v2675_v40  ;;  %v2704_v40 = vld [vmem:[#allocation5 + $0x318] sm:$0xf0]  ;;  %v2858_v15 = vld [vmem:[#allocation8 + $0x40] sm:$0xf]  ;;  %v3474_v16 = vld [vmem:[#allocation8 + $0x4c] sm:$0xf0] }
  0x84   :  { %1159 = vmatpush.bf16.msra.mxu2 %v2803_v31  ;;  %v2320_v31 = vld [vmem:[#allocation5 + $0x18] sm:$0xf0]  ;;  %v2707_v49 = vor.u32 %v3433_v39, %v2704_v40 }
  0x85   :  { %1133 = vmatpush.bf16.msra.mxu0 %v2547_v28  ;;  %v3337_v28 = vld [vmem:[#allocation5 + $0xc] sm:$0xf] }
  0x86   :  { %1121 = vmatpush.bf16.msrb.mxu3 %v2403_v30  ;;  %v3405_v30 = vld [vmem:[#allocation5 + $0x22c] sm:$0xf]  ;;  %v2323_v36 = vor.u32 %v3337_v28, %v2320_v31  ;;  %v3492_v28 = vld [vmem:[#allocation8 + $0xe4] sm:$0xf]  ;;  %v2940_v31 = vld [vmem:[#allocation8 + $0xf0] sm:$0xf0] }
  0x87   :  { %1147 = vmatpush.bf16.msra.mxu1 %v2659_v53  ;;  %v2595_v43 = vor.u32 %v3405_v30, %v2592_v35  ;;  %v2922_v53 = vld [vmem:[#allocation8 + $0xc0] sm:$0xf]  ;;  %v2943_v33 = vor.u32 %v3492_v28, %v2940_v31  ;;  %v3498_v30 = vld [vmem:[#allocation8 + $0x10c] sm:$0xf0]  ;;  %v2924_v35 = vld [vmem:[#allocation8 + $0xd0] sm:$0xf0] }
  0x88   :  { %1160 = vmatpush.bf16.msra.mxu2 %v2787_v42  ;;  %v3494_v42 = vld [vmem:[#allocation8 + $0xec] sm:$0xf0] }
  0x89   :  { %1134 = vmatpush.bf16.msra.mxu0 %v2531_v41  ;;  %v2938_v41 = vld [vmem:[#allocation8 + $0xe0] sm:$0xf] }
  0x8a   :  { %1122 = vmatpush.bf16.msrb.mxu3 %v2387_v46  ;;  %v3401_v46 = vld [vmem:[#allocation5 + $0x20c] sm:$0xf]  ;;  %v2939_v50 = vor.u32 %v3494_v42, %v2938_v41  ;;  %v3520_v41 = vld [vmem:[#allocation8 + $0x1c4] sm:$0xf]  ;;  %v3052_v42 = vld [vmem:[#allocation8 + $0x1d0] sm:$0xf0] }
  0x8b   :  { %2822 = vmatmul.msk.bf16.vlgmr.msrb.gmra.mxu2 %vm907_vm1, %v3858_v47  ;;  %1148 = vmatpush.bf16.msra.mxu1 %v2643_v4  ;;  %v3034_v4 = vld [vmem:[#allocation8 + $0x1a0] sm:$0xf] }
  0x8c   :  { %1161 = vmatpush.bf16.msra.mxu2 %v2771_v56  ;;  %v2579_v56 = vor.u32 %v3401_v46, %v2576_v48  ;;  %v3055_v46 = vor.u32 %v3520_v41, %v3052_v42  ;;  %v3194_v48 = vld [vmem:[#allocation8 + $0x2e0] sm:$0xf] }
  0x8d   :  { %1135 = vmatpush.bf16.msra.mxu0 %v2515_v55  ;;  %v3490_v55 = vld [vmem:[#allocation8 + $0xcc] sm:$0xf0]  ;;  %v3114_v42 = vld [vmem:[#allocation8 + $0x240] sm:$0xf] }
  0x8e   :  { %1123 = vmatpush.bf16.msrb.mxu3 %v2371_v62  ;;  %v2923_v59 = vor.u32 %v3490_v55, %v2922_v53  ;;  %v3522_v62 = vld [vmem:[#allocation8 + $0x1cc] sm:$0xf0]  ;;  %v2892_v55 = vld [vmem:[#allocation8 + $0x90] sm:$0xf0] }
  0x8f   :  { %1149 = vmatpush.bf16.msra.mxu1 %v2627_v17  ;;  %v3051_v1 = vor.u32 %v3522_v62, %v3050_v61  ;;  %v2859_v17 = vor.u32 %v3474_v16, %v2858_v15  ;;  %v3178_v62 = vld [vmem:[#allocation8 + $0x2c0] sm:$0xf]  ;;  %v3508_v15 = vld [vmem:[#allocation8 + $0x164] sm:$0xf]  ;;  %v3004_v16 = vld [vmem:[#allocation8 + $0x170] sm:$0xf0] }
  0x90   :  { %1162 = vmatpush.bf16.msra.mxu2 %v2755_v6 }
  0x91   :  { %1136 = vmatpush.bf16.msra.mxu0 %v2499_v5  ;;  %v3518_v5 = vld [vmem:[#allocation8 + $0x1ac] sm:$0xf0] }
  0x92   :  { %1124 = vmatpush.bf16.msrb.mxu3 %v2355_v11  ;;  %v3035_v6 = vor.u32 %v3518_v5, %v3034_v4  ;;  %v2874_v11 = vld [vmem:[#allocation8 + $0x60] sm:$0xf]  ;;  %v3476_v4 = vld [vmem:[#allocation8 + $0x64] sm:$0xf]  ;;  %v2876_v5 = vld [vmem:[#allocation8 + $0x70] sm:$0xf0] }
  0x93   :  { %1150 = vmatpush.bf16.msra.mxu1 %v2611_v32 }
  0x94   :  { %1163 = vmatpush.bf16.msra.mxu2 %v2739_v20  ;;  %v2842_v20 = vld [vmem:[#allocation8 + $0x20] sm:$0xf] }
  0x95   :  { %1137 = vmatpush.bf16.msra.mxu0 %v2483_v19  ;;  %v3506_v19 = vld [vmem:[#allocation8 + $0x14c] sm:$0xf0]  ;;  %v2843_v23 = vor.u32 %v3470_v21, %v2842_v20 }
  0x96   :  { %1125 = vmatpush.bf16.msrb.mxu3 %v2339_v24  ;;  %v2987_v22 = vor.u32 %v3506_v19, %v2986_v18  ;;  %v2826_v24 = vld [vmem:[#allocation8] sm:$0xf]  ;;  %v3007_v18 = vor.u32 %v3508_v15, %v3004_v16  ;;  %v3546_v20 = vld [vmem:[#allocation8 + $0x28c] sm:$0xf0] }
  0x97   :  { %1151 = vmatpush.bf16.msra.mxu1 %v2595_v43  ;;  %v2827_v32 = vor.u32 %v3466_v25, %v2826_v24  ;;  %v3888_v43 = vld [vmem:[#allocation7] sm:$0xf]  ;;  %v3146_v19 = vld [vmem:[#allocation8 + $0x280] sm:$0xf]  ;;  %v3504_v24 = vld [vmem:[#allocation8 + $0x144] sm:$0xf] }
  0x98   :  { %1164 = vmatpush.bf16.msra.mxu2 %v2723_v34  ;;  %v2954_v34 = vld [vmem:[#allocation8 + $0x100] sm:$0xf]  ;;  %v2988_v25 = vld [vmem:[#allocation8 + $0x150] sm:$0xf0] }
  0x99   :  { %1138 = vmatpush.bf16.msra.mxu0 %v2467_v29  ;;  %v3488_v29 = vld [vmem:[#allocation8 + $0xc4] sm:$0xf]  ;;  %v2955_v38 = vor.u32 %v3498_v30, %v2954_v34  ;;  %v2991_v31 = vor.u32 %v3504_v24, %v2988_v25  ;;  %v3306_v16 = vld [vmem:[#allocation8 + $0x3c0] sm:$0xf] }
  0x9a   :  { %1126 = vmatpush.bf16.msrb.mxu3 %v2323_v36  ;;  %v3524_v36 = vld [vmem:[#allocation8 + $0x1e4] sm:$0xf]  ;;  %v2927_v40 = vor.u32 %v3488_v29, %v2924_v35  ;;  %v2828_v35 = vld [vmem:[#allocation8 + $0x10] sm:$0xf0] }
  0x9b   :  { %1152 = vmatpush.bf16.msra.mxu1 %v2579_v56  ;;  %v3071_v39 = vor.u32 %v3524_v36, %v3068_v37  ;;  %v3516_v56 = vld [vmem:[#allocation8 + $0x1a4] sm:$0xf] }
  0x9c   :  { %1165 = vmatpush.bf16.msra.mxu2 %v2707_v49  ;;  %v3558_v49 = vld [vmem:[#allocation8 + $0x2ec] sm:$0xf0]  ;;  %v3464_v34 = vld [vmem:[#allocation8 + $0x4] sm:$0xf] }
  0x9d   :  { %1127 = vmatmul.bf16.vlgmr.msrb.gmra.mxu3 %v3844_v54  ;;  %1139 = vmatpush.bf16.msra.mxu0 %v2451_v45  ;;  %v3482_v54 = vld [vmem:[#allocation8 + $0x8c] sm:$0xf0]  ;;  %v2908_v45 = vld [vmem:[#allocation8 + $0xb0] sm:$0xf0]  ;;  %v3195_v53 = vor.u32 %v3558_v49, %v3194_v48  ;;  %v3500_v37 = vld [vmem:[#allocation8 + $0x124] sm:$0xf] }
  0x9e   :  { %1178 = vmatpush.bf16.msra.mxu3 %v922_v44  ;;  %1153 = vmatmul.bf16.vlgmr.msra.gmra.mxu1 %v3846_v58  ;;  %v2891_v7 = vor.u32 %v3482_v54, %v2890_v3  ;;  %v3003_v58 = vor.u32 %v3510_v14, %v3002_v13  ;;  %v3484_v44 = vld [vmem:[#allocation8 + $0xa4] sm:$0xf]  ;;  %v3020_v54 = vld [vmem:[#allocation8 + $0x190] sm:$0xf0]  ;;  %v2946_v48 = vld [vmem:[#allocation8 + $0xe8] sm:$0xf] }
  0x9f   :  { %1166 = vmatmul.bf16.vlgmr.msra.gmra.mxu2 %v3849_v60  ;;  %1991 = vmatpush.bf16.msrb.mxu1 %v3067_v57  ;;  %v3019_v60 = vor.u32 %v3514_v9, %v3018_v8  ;;  %v2911_v51 = vor.u32 %v3484_v44, %v2908_v45  ;;  %v3036_v57 = vld [vmem:[#allocation8 + $0x1b0] sm:$0xf0]  ;;  %v3512_v3 = vld [vmem:[#allocation8 + $0x184] sm:$0xf]  ;;  %v3162_v8 = vld [vmem:[#allocation8 + $0x2a0] sm:$0xf] }
  0xa0   :  { %1140 = vmatmul.bf16.vlgmr.msra.gmra.mxu0 %v3854_v10  ;;  %v3478_v10 = vld [vmem:[#allocation8 + $0x6c] sm:$0xf0]  ;;  %2004 = vmatpush.bf16.msrb.mxu2 %v3195_v53  ;;  %v3039_v61 = vor.u32 %v3516_v56, %v3036_v57  ;;  %v2860_v14 = vld [vmem:[#allocation8 + $0x50] sm:$0xf0] }
  0xa1   :  { %1978 = vmatpush.bf16.msrb.mxu0 %v2939_v50  ;;  %v2875_v12 = vor.u32 %v3478_v10, %v2874_v11  ;;  %v232_v50 = vperm.slane %v3888_v43, 0  ;;  %v3550_v9 = vld [vmem:[#allocation8 + $0x2ac] sm:$0xf0]  ;;  %v2879_v10 = vor.u32 %v3476_v4, %v2876_v5 }
  0xa2   :  { %v3538_v44 = vld [vmem:[#allocation8 + $0x24c] sm:$0xf0] }
  0xa3   :  { %1992 = vmatpush.bf16.msrb.mxu1 %v3051_v1  ;;  %v2895_v1 = vor.u32 %v3480_v52, %v2892_v55  ;;  %v3115_v49 = vor.u32 %v3538_v44, %v3114_v42  ;;  %v2956_v52 = vld [vmem:[#allocation8 + $0x110] sm:$0xf0]  ;;  %v3475_v42 = vld [vmem:[#allocation8 + $0x54] sm:$0xf0] }
  0xa5   :  { %1979 = vmatpush.bf16.msrb.mxu0 %v2923_v59 }
  0xa7   :  { %1993 = vmatpush.bf16.msrb.mxu1 %v3035_v6 }
  0xa9   :  { %1980 = vmatpush.bf16.msrb.mxu0 %v2907_v2  ;;  %v3179_v2 = vor.u32 %v3554_v63, %v3178_v62  ;;  %v2930_v63 = vld [vmem:[#allocation8 + $0xc8] sm:$0xf] }
  0xab   :  { %1994 = vmatpush.bf16.msrb.mxu1 %v3019_v60  ;;  %2005 = vmatpush.bf16.msrb.mxu2 %v3179_v2  ;;  %v3472_v60 = vld [vmem:[#allocation8 + $0x44] sm:$0xf] }
  0xad   :  { %1981 = vmatpush.bf16.msrb.mxu0 %v2891_v7  ;;  %2823 = vmatmul.msk.bf16.vlgmr.msra.gmra.mxu3 %vm907_vm1, %v3858_v47  ;;  %v2971_v47 = vor.u32 %v3502_v27, %v2970_v26  ;;  %v3023_v7 = vor.u32 %v3512_v3, %v3020_v54  ;;  %v3468_v26 = vld [vmem:[#allocation8 + $0x24] sm:$0xf]  ;;  %v2844_v27 = vld [vmem:[#allocation8 + $0x30] sm:$0xf0]  ;;  %v3082_v3 = vld [vmem:[#allocation8 + $0x200] sm:$0xf] }
  0xae   :  { %v2847_v29 = vor.u32 %v3468_v26, %v2844_v27  ;;  %v3530_v54 = vld [vmem:[#allocation8 + $0x20c] sm:$0xf0]  ;;  %v3290_v26 = vld [vmem:[#allocation8 + $0x3a0] sm:$0xf] }
  0xaf   :  { %1995 = vmatpush.bf16.msrb.mxu1 %v3003_v58  ;;  %v3083_v5 = vor.u32 %v3530_v54, %v3082_v3  ;;  %v3582_v27 = vld [vmem:[#allocation8 + $0x3ac] sm:$0xf0] }
  0xb1   :  { %1982 = vmatpush.bf16.msrb.mxu0 %v2875_v12  ;;  %v3163_v12 = vor.u32 %v3550_v9, %v3162_v8  ;;  %v3556_v8 = vld [vmem:[#allocation8 + $0x2e4] sm:$0xf]  ;;  %v2914_v9 = vld [vmem:[#allocation8 + $0xa8] sm:$0xf] }
  0xb3   :  { %1996 = vmatpush.bf16.msrb.mxu1 %v2987_v22  ;;  %2006 = vmatpush.bf16.msrb.mxu2 %v3163_v12  ;;  %v2863_v22 = vor.u32 %v3472_v60, %v2860_v14  ;;  %v3196_v60 = vld [vmem:[#allocation8 + $0x2f0] sm:$0xf0] }
  0xb4   :  { %v3199_v12 = vor.u32 %v3556_v8, %v3196_v60  ;;  %v3467_v8 = vld [vmem:[#allocation8 + $0x14] sm:$0xf0] }
  0xb5   :  { %1983 = vmatpush.bf16.msrb.mxu0 %v2859_v17  ;;  %v3527_v60 = vld [vmem:[#allocation8 + $0x1f4] sm:$0xf0] }
  0xb7   :  { %1997 = vmatpush.bf16.msrb.mxu1 %v2971_v47  ;;  %v3130_v47 = vld [vmem:[#allocation8 + $0x260] sm:$0xf] }
  0xb8   :  { %v933_v59 = vpop.f32.mrf.mxu0 }
  0xb9   :  { %1984 = vmatpush.bf16.msrb.mxu0 %v2843_v23  ;;  %v934_v0 = vadd.f32 %v933_v59, %v232_v50  ;;  %v946_v6 = vpop.f32.mrf.mxu1  ;;  %v3147_v23 = vor.u32 %v3546_v20, %v3146_v19  ;;  %v3495_v50 = vld [vmem:[#allocation8 + $0xf4] sm:$0xf0]  ;;  %v3098_v59 = vld [vmem:[#allocation8 + $0x220] sm:$0xf] }
  0xba   :  { %v2947_v57 = vor.u32 %v3495_v50, %v2946_v48  ;;  %v3483_v19 = vld [vmem:[#allocation8 + $0x94] sm:$0xf0] }
  0xbb   :  { %1998 = vmatpush.bf16.msrb.mxu1 %v2955_v38  ;;  %v947_v11 = vadd.f32 %v946_v6, %v934_v0  ;;  %2007 = vmatpush.bf16.msrb.mxu2 %v3147_v23  ;;  %v2972_v38 = vld [vmem:[#allocation8 + $0x130] sm:$0xf0]  ;;  %v3491_v0 = vld [vmem:[#allocation8 + $0xd4] sm:$0xf0]  ;;  %v3322_v6 = vld [vmem:[#allocation8 + $0x3e0] sm:$0xf] }
  0xbc   :  { %v2975_v41 = vor.u32 %v3500_v37, %v2972_v38  ;;  %v2931_v4 = vor.u32 %v3491_v0, %v2930_v63  ;;  %v3274_v38 = vld [vmem:[#allocation8 + $0x380] sm:$0xf]  ;;  %v2834_v0 = vld [vmem:[#allocation8 + $0x8] sm:$0xf] }
  0xbd   :  { %1985 = vmatpush.bf16.msrb.mxu0 %v2827_v32  ;;  %v3542_v32 = vld [vmem:[#allocation8 + $0x26c] sm:$0xf0] }
  0xbe   :  { %v3131_v30 = vor.u32 %v3542_v32, %v3130_v47  ;;  %v3479_v47 = vld [vmem:[#allocation8 + $0x74] sm:$0xf0]  ;;  %v3291_v32 = vor.u32 %v3582_v27, %v3290_v26  ;;  %v3489_v26 = vld [vmem:[#allocation8 + $0xcc] sm:$0xf]  ;;  %v2932_v27 = vld [vmem:[#allocation8 + $0xd8] sm:$0xf0] }
  0xbf   :  { %2043 = vmatpush.bf16.msra.mxu1 %v3071_v39 }
  0xc0   :  { %v959_v13 = vpop.f32.mrf.mxu2  ;;  %v935_v17 = vpop.f32.mrf.mxu0  ;;  %2008 = vmatpush.bf16.msrb.mxu2 %v3131_v30 }
  0xc1   :  { %2030 = vmatpush.bf16.msra.mxu0 %v2943_v33  ;;  %v960_v21 = vadd.f32 %v959_v13, %v947_v11  ;;  %v948_v28 = vpop.f32.mrf.mxu1  ;;  %v3487_v11 = vld [vmem:[#allocation8 + $0xb4] sm:$0xf0]  ;;  %v233_v13 = vperm.slane %v3888_v43, 1  ;;  %v3552_v17 = vld [vmem:[#allocation8 + $0x2c4] sm:$0xf] }
  0xc2   :  { %v972_v58 = vpop.f32.mrf.mxu3  ;;  %v2915_v15 = vor.u32 %v3487_v11, %v2914_v9  ;;  %v3548_v28 = vld [vmem:[#allocation8 + $0x2a4] sm:$0xf]  ;;  %v3074_v9 = vld [vmem:[#allocation8 + $0x1e8] sm:$0xf] }
  0xc3   :  { %2044 = vmatpush.bf16.msra.mxu1 %v3055_v46  ;;  %v973_v33 = vadd.f32 %v972_v58, %v960_v21  ;;  %v2831_v46 = vor.u32 %v3464_v34, %v2828_v35  ;;  %v3586_v58 = vld [vmem:[#allocation8 + $0x3cc] sm:$0xf0]  ;;  %v3180_v21 = vld [vmem:[#allocation8 + $0x2d0] sm:$0xf0] }
  0xc4   :  { %2009 = vmatpush.bf16.msrb.mxu2 %v3115_v49  ;;  %v3307_v20 = vor.u32 %v3586_v58, %v3306_v16  ;;  %v2835_v16 = vor.u32 %v3467_v8, %v2834_v0  ;;  %v3058_v58 = vld [vmem:[#allocation8 + $0x1c8] sm:$0xf]  ;;  %v3511_v0 = vld [vmem:[#allocation8 + $0x174] sm:$0xf0] }
  0xc5   :  { %2031 = vmatpush.bf16.msra.mxu0 %v2927_v40 }
  0xc7   :  { %2045 = vmatpush.bf16.msra.mxu1 %v3039_v61  ;;  %v3534_v61 = vld [vmem:[#allocation8 + $0x22c] sm:$0xf0] }
  0xc8   :  { %v961_v36 = vpop.f32.mrf.mxu2  ;;  %v985_v40 = vpop.f32.mrf.mxu0 }
  0xc9   :  { %2032 = vmatpush.bf16.msra.mxu0 %v2911_v51  ;;  %v986_v45 = vadd.f32 %v985_v40, %v973_v33  ;;  %v3496_v51 = vld [vmem:[#allocation8 + $0x104] sm:$0xf]  ;;  %v3164_v33 = vld [vmem:[#allocation8 + $0x2b0] sm:$0xf0] }
  0xca   :  { %v974_v39 = vpop.f32.mrf.mxu3  ;;  %v2959_v55 = vor.u32 %v3496_v51, %v2956_v52  ;;  %v3544_v40 = vld [vmem:[#allocation8 + $0x284] sm:$0xf]  ;;  %v3258_v51 = vld [vmem:[#allocation8 + $0x360] sm:$0xf]  ;;  %v3574_v52 = vld [vmem:[#allocation8 + $0x36c] sm:$0xf0] }
  0xcb   :  { %2046 = vmatpush.bf16.msra.mxu1 %v3023_v7  ;;  %vm1184_vm2 = vcmp.ge.f32.partialorder %v986_v45, 0.0  ;;  %v1188_v53 = vmul.f32 0.2, %v986_v45  ;;  %v3590_v7 = vld [vmem:[#allocation8 + $0x3ec] sm:$0xf0] }
  0xcc   :  { %v3578_v39 = vld [vmem:[#allocation8 + $0x38c] sm:$0xf0] }
  0xcd   :  { %2033 = vmatpush.bf16.msra.mxu0 %v2895_v1  ;;  %v1192_v56 = vsel %vm1184_vm2, %v986_v45, %v1188_v53  ;;  %v3099_v1 = vor.u32 %v3534_v61, %v3098_v59  ;;  %v3275_v44 = vor.u32 %v3578_v39, %v3274_v38  ;;  %v3148_v45 = vld [vmem:[#allocation8 + $0x290] sm:$0xf0]  ;;  %v3540_v53 = vld [vmem:[#allocation8 + $0x264] sm:$0xf]  ;;  %v3259_v59 = vor.u32 %v3574_v52, %v3258_v51  ;;  %v3519_v39 = vld [vmem:[#allocation8 + $0x1b4] sm:$0xf0] }
  0xce   :  { %v3891_v62 = vpack.c.bf16 %v1192_v56, %v1192_v56  ;;  %v3151_v48 = vor.u32 %v3544_v40, %v3148_v45  ;;  %v2850_v56 = vld [vmem:[#allocation8 + $0x28] sm:$0xf]  ;;  %v3132_v61 = vld [vmem:[#allocation8 + $0x270] sm:$0xf0]  ;;  %v3485_v40 = vld [vmem:[#allocation8 + $0xac] sm:$0xf] }
  0xcf   :  { %2047 = vmatpush.bf16.msra.mxu1 %v3007_v18  ;;  %2010 = vmatpush.bf16.msrb.mxu2 %v3099_v1  ;;  %v2898_v18 = vld [vmem:[#allocation8 + $0x88] sm:$0xf]  ;;  %v3135_v63 = vor.u32 %v3540_v53, %v3132_v61  ;;  %v3324_v38 = vld [vmem:[#allocation8 + $0x3f0] sm:$0xf0]  ;;  %v3481_v51 = vld [vmem:[#allocation8 + $0x8c] sm:$0xf] }
  0xd0   :  { %1986 = vmatmul.bf16.vlgmr.msrb.gmra.mxu0 %v3891_v62  ;;  %v987_v2 = vpop.f32.mrf.mxu0  ;;  %v2899_v24 = vor.u32 %v3483_v19, %v2898_v18  ;;  %v3075_v19 = vor.u32 %v3527_v60, %v3074_v9  ;;  %v2900_v52 = vld [vmem:[#allocation8 + $0x98] sm:$0xf0]  ;;  %v3584_v53 = vld [vmem:[#allocation8 + $0x3c4] sm:$0xf]  ;;  %v3507_v60 = vld [vmem:[#allocation8 + $0x154] sm:$0xf0] }
  0xd1   :  { %2034 = vmatpush.bf16.msra.mxu0 %v2879_v10  ;;  %v3323_v10 = vor.u32 %v3590_v7, %v3322_v6  ;;  %v3536_v6 = vld [vmem:[#allocation8 + $0x244] sm:$0xf]  ;;  %v2903_v61 = vor.u32 %v3481_v51, %v2900_v52  ;;  %v3521_v51 = vld [vmem:[#allocation8 + $0x1cc] sm:$0xf]  ;;  %v3060_v52 = vld [vmem:[#allocation8 + $0x1d8] sm:$0xf0] }
  0xd3   :  { %2048 = vmatpush.bf16.msra.mxu1 %v2991_v31  ;;  %2017 = vmatpush.bf16.msrb.mxu3 %v3323_v10  ;;  %v2882_v31 = vld [vmem:[#allocation8 + $0x68] sm:$0xf]  ;;  %v3116_v10 = vld [vmem:[#allocation8 + $0x250] sm:$0xf0] }
  0xd4   :  { %2011 = vmatpush.bf16.msrb.mxu2 %v3083_v5  ;;  %v2883_v36 = vor.u32 %v3479_v47, %v2882_v31  ;;  %v3570_v5 = vld [vmem:[#allocation8 + $0x34c] sm:$0xf0]  ;;  %v3042_v47 = vld [vmem:[#allocation8 + $0x1a8] sm:$0xf] }
  0xd5   :  { %2035 = vmatpush.bf16.msra.mxu0 %v2863_v22  ;;  %v3183_v22 = vor.u32 %v3552_v17, %v3180_v21  ;;  %v3226_v17 = vld [vmem:[#allocation8 + $0x320] sm:$0xf]  ;;  %v3566_v21 = vld [vmem:[#allocation8 + $0x32c] sm:$0xf0] }
  0xd7   :  { %2049 = vmatpush.bf16.msra.mxu1 %v2975_v41  ;;  %v998_v14 = vpop.f32.mrf.mxu1  ;;  %2018 = vmatpush.bf16.msrb.mxu3 %v3307_v20  ;;  %v2866_v41 = vld [vmem:[#allocation8 + $0x48] sm:$0xf] }
  0xd8   :  { %2056 = vmatpush.bf16.msra.mxu2 %v3199_v12  ;;  %v999_v23 = vadd.f32 %v998_v14, %v233_v13  ;;  %v2867_v49 = vor.u32 %v3475_v42, %v2866_v41  ;;  %v3493_v12 = vld [vmem:[#allocation8 + $0xec] sm:$0xf]  ;;  %v2948_v13 = vld [vmem:[#allocation8 + $0xf8] sm:$0xf0]  ;;  %v3119_v14 = vor.u32 %v3536_v6, %v3116_v10  ;;  %v2994_v10 = vld [vmem:[#allocation8 + $0x148] sm:$0xf] }
  0xd9   :  { %2036 = vmatpush.bf16.msra.mxu0 %v2847_v29  ;;  %v3167_v29 = vor.u32 %v3548_v28, %v3164_v33  ;;  %v2951_v20 = vor.u32 %v3493_v12, %v2948_v13  ;;  %v3227_v28 = vor.u32 %v3566_v21, %v3226_v17  ;;  %v3210_v33 = vld [vmem:[#allocation8 + $0x300] sm:$0xf]  ;;  %v2916_v41 = vld [vmem:[#allocation8 + $0xb8] sm:$0xf0]  ;;  %v3473_v12 = vld [vmem:[#allocation8 + $0x4c] sm:$0xf] }
  0xda   :  { %v2868_v13 = vld [vmem:[#allocation8 + $0x58] sm:$0xf0]  ;;  %v3503_v21 = vld [vmem:[#allocation8 + $0x134] sm:$0xf0] }
  0xdb   :  { %2050 = vmatpush.bf16.msra.mxu1 %v2959_v55  ;;  %2019 = vmatpush.bf16.msrb.mxu3 %v3291_v32 }
  0xdc   :  { %2057 = vmatpush.bf16.msra.mxu2 %v3183_v22  ;;  %v3532_v22 = vld [vmem:[#allocation8 + $0x224] sm:$0xf] }
  0xdd   :  { %2037 = vmatpush.bf16.msra.mxu0 %v2831_v46  ;;  %v1037_v25 = vpop.f32.mrf.mxu0 }
  0xde   :  { %v1011_v34 = vpop.f32.mrf.mxu2 }
  0xdf   :  { %v1000_v30 = vpop.f32.mrf.mxu1  ;;  %v1012_v35 = vadd.f32 %v1011_v34, %v999_v23  ;;  %2020 = vmatpush.bf16.msrb.mxu3 %v3275_v44  ;;  %v3100_v23 = vld [vmem:[#allocation8 + $0x230] sm:$0xf0]  ;;  %v3528_v34 = vld [vmem:[#allocation8 + $0x204] sm:$0xf] }
  0xe0   :  { %v1024_v37 = vpop.f32.mrf.mxu3  ;;  %2058 = vmatpush.bf16.msra.mxu2 %v3167_v29  ;;  %2038 = vmatmul.bf16.vlgmr.msra.gmra.mxu0 %v3891_v62  ;;  %v3103_v31 = vor.u32 %v3532_v22, %v3100_v23  ;;  %v3562_v29 = vld [vmem:[#allocation8 + $0x30c] sm:$0xf0]  ;;  %v3469_v22 = vld [vmem:[#allocation8 + $0x2c] sm:$0xf]  ;;  %v2852_v23 = vld [vmem:[#allocation8 + $0x38] sm:$0xf0] }
  0xe1   :  { %2082 = vmatpush.bf16.msrb.mxu0 %v2947_v57  ;;  %v1025_v46 = vadd.f32 %v1024_v37, %v1012_v35  ;;  %v3471_v57 = vld [vmem:[#allocation8 + $0x34] sm:$0xf0]  ;;  %v2935_v35 = vor.u32 %v3489_v26, %v2932_v27  ;;  %v3588_v37 = vld [vmem:[#allocation8 + $0x3e4] sm:$0xf]  ;;  %v3211_v42 = vor.u32 %v3562_v29, %v3210_v33  ;;  %v3260_v27 = vld [vmem:[#allocation8 + $0x370] sm:$0xf0]  ;;  %v2855_v29 = vor.u32 %v3469_v22, %v2852_v23 }
  0xe2   :  { %v2851_v3 = vor.u32 %v3471_v57, %v2850_v56  ;;  %v3327_v45 = vor.u32 %v3588_v37, %v3324_v38  ;;  %v234_v57 = vperm.slane %v3888_v43, 2  ;;  %v3572_v26 = vld [vmem:[#allocation8 + $0x364] sm:$0xf]  ;;  %v3244_v38 = vld [vmem:[#allocation8 + $0x350] sm:$0xf0] }
  0xe3   :  { %v1038_v55 = vadd.f32 %v1037_v25, %v1025_v46  ;;  %2021 = vmatpush.bf16.msrb.mxu3 %v3259_v59  ;;  %v3523_v25 = vld [vmem:[#allocation8 + $0x1d4] sm:$0xf0]  ;;  %v3043_v46 = vor.u32 %v3519_v39, %v3042_v47  ;;  %v3568_v37 = vld [vmem:[#allocation8 + $0x344] sm:$0xf]  ;;  %v3154_v22 = vld [vmem:[#allocation8 + $0x288] sm:$0xf] }
  0xe4   :  { %2059 = vmatpush.bf16.msra.mxu2 %v3151_v48  ;;  %v3059_v30 = vor.u32 %v3523_v25, %v3058_v58  ;;  %v2919_v48 = vor.u32 %v3485_v40, %v2916_v41  ;;  %v3525_v40 = vld [vmem:[#allocation8 + $0x1ec] sm:$0xf]  ;;  %v3076_v41 = vld [vmem:[#allocation8 + $0x1f8] sm:$0xf0]  ;;  %v3547_v23 = vld [vmem:[#allocation8 + $0x294] sm:$0xf0] }
  0xe5   :  { %2083 = vmatpush.bf16.msrb.mxu0 %v2931_v4  ;;  %v1039_v50 = vpop.f32.mrf.mxu0  ;;  %v3242_v4 = vld [vmem:[#allocation8 + $0x340] sm:$0xf] }
  0xe6   :  { %v1013_v1 = vpop.f32.mrf.mxu2  ;;  %v3243_v11 = vor.u32 %v3570_v5, %v3242_v4  ;;  %v3515_v50 = vld [vmem:[#allocation8 + $0x194] sm:$0xf0]  ;;  %v3292_v4 = vld [vmem:[#allocation8 + $0x3b0] sm:$0xf0] }
  0xe7   :  { %v1050_v2 = vpop.f32.mrf.mxu1  ;;  %v3477_v1 = vld [vmem:[#allocation8 + $0x6c] sm:$0xf] }
  0xe8   :  { %v1026_v54 = vpop.f32.mrf.mxu3  ;;  %v1051_v7 = vadd.f32 %v1050_v2, %v1038_v55  ;;  %2060 = vmatpush.bf16.msra.mxu2 %v3135_v63  ;;  %2022 = vmatpush.bf16.msrb.mxu3 %v3243_v11  ;;  %v3308_v55 = vld [vmem:[#allocation8 + $0x3d0] sm:$0xf0]  ;;  %v3010_v63 = vld [vmem:[#allocation8 + $0x168] sm:$0xf]  ;;  %v2884_v2 = vld [vmem:[#allocation8 + $0x78] sm:$0xf0] }
  0xe9   :  { %2084 = vmatpush.bf16.msrb.mxu0 %v2915_v15  ;;  %v3311_v56 = vor.u32 %v3584_v53, %v3308_v55  ;;  %v3580_v54 = vld [vmem:[#allocation8 + $0x3a4] sm:$0xf]  ;;  %v3011_v9 = vor.u32 %v3511_v0, %v3010_v63  ;;  %v2887_v11 = vor.u32 %v3477_v1, %v2884_v2  ;;  %v3517_v63 = vld [vmem:[#allocation8 + $0x1ac] sm:$0xf]  ;;  %v3212_v1 = vld [vmem:[#allocation8 + $0x310] sm:$0xf0] }
  0xea   :  { %vm1185_vm3 = vcmp.ge.f32.partialorder %v1051_v7, 0.0  ;;  %v1189_v15 = vmul.f32 0.2, %v1051_v7  ;;  %v3295_v5 = vor.u32 %v3580_v54, %v3292_v4  ;;  %v3560_v0 = vld [vmem:[#allocation8 + $0x304] sm:$0xf] }
  0xeb   :  { %v3215_v54 = vor.u32 %v3560_v0, %v3212_v1  ;;  %v3204_v0 = vld [vmem:[#allocation8 + $0x2f8] sm:$0xf0] }
  0xec   :  { %v1193_v18 = vsel %vm1185_vm3, %v1051_v7, %v1189_v15  ;;  %2061 = vmatpush.bf16.msra.mxu2 %v3119_v14  ;;  %2023 = vmatpush.bf16.msrb.mxu3 %v3227_v28  ;;  %v3576_v14 = vld [vmem:[#allocation8 + $0x384] sm:$0xf]  ;;  %v3276_v15 = vld [vmem:[#allocation8 + $0x390] sm:$0xf0]  ;;  %v3263_v28 = vor.u32 %v3572_v26, %v3260_v27  ;;  %v2996_v26 = vld [vmem:[#allocation8 + $0x158] sm:$0xf0] }
  0xed   :  { %2085 = vmatpush.bf16.msrb.mxu0 %v2899_v24  ;;  %v3896_v24 = vpack.c.bf16 %v1193_v18, %v1193_v18  ;;  %v3279_v58 = vor.u32 %v3576_v14, %v3276_v15  ;;  %v2995_v18 = vor.u32 %v3507_v60, %v2994_v10  ;;  %v3028_v10 = vld [vmem:[#allocation8 + $0x198] sm:$0xf0]  ;;  %v3170_v14 = vld [vmem:[#allocation8 + $0x2a8] sm:$0xf]  ;;  %v3551_v15 = vld [vmem:[#allocation8 + $0x2b4] sm:$0xf0] }
  0xef   :  { %1999 = vmatmul.bf16.vlgmr.msrb.gmra.mxu1 %v3896_v24  ;;  %v1052_v32 = vpop.f32.mrf.mxu1 }
  0xf0   :  { %2095 = vmatpush.bf16.msrb.mxu1 %v3075_v19  ;;  %2062 = vmatpush.bf16.msra.mxu2 %v3103_v31  ;;  %v2871_v19 = vor.u32 %v3473_v12, %v2868_v13 }
  0xf1   :  { %2086 = vmatpush.bf16.msrb.mxu0 %v2883_v36  ;;  %v3084_v36 = vld [vmem:[#allocation8 + $0x210] sm:$0xf0]  ;;  %2024 = vmatpush.bf16.msrb.mxu3 %v3211_v42  ;;  %v3247_v42 = vor.u32 %v3568_v37, %v3244_v38 }
  0xf2   :  { %v3087_v44 = vor.u32 %v3528_v34, %v3084_v36  ;;  %v2962_v34 = vld [vmem:[#allocation8 + $0x108] sm:$0xf]  ;;  %v2836_v36 = vld [vmem:[#allocation8 + $0x18] sm:$0xf0] }
  0xf4   :  { %2096 = vmatpush.bf16.msrb.mxu1 %v3059_v30  ;;  %2063 = vmatpush.bf16.msra.mxu2 %v3087_v44  ;;  %v3499_v30 = vld [vmem:[#allocation8 + $0x114] sm:$0xf0] }
  0xf5   :  { %2087 = vmatpush.bf16.msrb.mxu0 %v2867_v49  ;;  %v3026_v49 = vld [vmem:[#allocation8 + $0x188] sm:$0xf]  ;;  %2069 = vmatpush.bf16.msra.mxu3 %v3327_v45  ;;  %v2963_v45 = vor.u32 %v3499_v30, %v2962_v34  ;;  %v2980_v34 = vld [vmem:[#allocation8 + $0x138] sm:$0xf0] }
  0xf6   :  { %v3027_v59 = vor.u32 %v3515_v50, %v3026_v49  ;;  %v3564_v49 = vld [vmem:[#allocation8 + $0x324] sm:$0xf]  ;;  %v3228_v50 = vld [vmem:[#allocation8 + $0x330] sm:$0xf0] }
  0xf7   :  { %v3231_v53 = vor.u32 %v3564_v49, %v3228_v50  ;;  %v3106_v49 = vld [vmem:[#allocation8 + $0x228] sm:$0xf]  ;;  %v3535_v50 = vld [vmem:[#allocation8 + $0x234] sm:$0xf0] }
  0xf8   :  { %2097 = vmatpush.bf16.msrb.mxu1 %v3043_v46 }
  0xf9   :  { %2088 = vmatpush.bf16.msrb.mxu0 %v2851_v3  ;;  %2070 = vmatpush.bf16.msra.mxu3 %v3311_v56 }
  0xfb   :  { %v1102_v7 = vpop.f32.mrf.mxu1 }
  0xfc   :  { %2098 = vmatpush.bf16.msrb.mxu1 %v3027_v59  ;;  %v3559_v59 = vld [vmem:[#allocation8 + $0x2f4] sm:$0xf0] }
  0xfd   :  { %2089 = vmatpush.bf16.msrb.mxu0 %v2835_v16  ;;  %v1089_v3 = vpop.f32.mrf.mxu0  ;;  %2071 = vmatpush.bf16.msra.mxu3 %v3295_v5 }
  0xfe   :  { %v1063_v6 = vpop.f32.mrf.mxu2 }
  0xff   :  { %v1064_v8 = vadd.f32 %v1063_v6, %v234_v57  ;;  %2051 = vmatmul.bf16.vlgmr.msra.gmra.mxu1 %v3896_v24  ;;  %v3202_v57 = vld [vmem:[#allocation8 + $0x2e8] sm:$0xf] }
 0x100   :  { %2090 = vmatmul.bf16.vlgmr.msrb.gmra.mxu0 %v3891_v62  ;;  %v1076_v16 = vpop.f32.mrf.mxu3  ;;  %2099 = vmatpush.bf16.msrb.mxu1 %v3011_v9  ;;  %v3203_v5 = vor.u32 %v3559_v59, %v3202_v57  ;;  %v3555_v9 = vld [vmem:[#allocation8 + $0x2d4] sm:$0xf0]  ;;  %v3330_v59 = vld [vmem:[#allocation8 + $0x3e8] sm:$0xf] }
 0x101   :  { %2134 = vmatpush.bf16.msra.mxu0 %v2951_v20  ;;  %v1077_v17 = vadd.f32 %v1076_v16, %v1064_v8  ;;  %v2978_v20 = vld [vmem:[#allocation8 + $0x128] sm:$0xf]  ;;  %2072 = vmatpush.bf16.msra.mxu3 %v3279_v58  ;;  %v3509_v16 = vld [vmem:[#allocation8 + $0x16c] sm:$0xf]  ;;  %v3012_v58 = vld [vmem:[#allocation8 + $0x178] sm:$0xf0] }
 0x102   :  { %v2979_v33 = vor.u32 %v3503_v21, %v2978_v20  ;;  %v3186_v8 = vld [vmem:[#allocation8 + $0x2c8] sm:$0xf]  ;;  %v3015_v21 = vor.u32 %v3509_v16, %v3012_v58  ;;  %v3531_v57 = vld [vmem:[#allocation8 + $0x214] sm:$0xf0] }
 0x103   :  { %v1104_v47 = vpop.f32.mrf.mxu1  ;;  %v1090_v32 = vadd.f32 %v1089_v3, %v1077_v17  ;;  %v3044_v3 = vld [vmem:[#allocation8 + $0x1b8] sm:$0xf0]  ;;  %v3187_v12 = vor.u32 %v3555_v9, %v3186_v8  ;;  %v235_v17 = vperm.slane %v3888_v43, 3  ;;  %v3501_v43 = vld [vmem:[#allocation8 + $0x12c] sm:$0xf] }
 0x104   :  { %2100 = vmatpush.bf16.msrb.mxu1 %v2995_v18  ;;  %v2983_v38 = vor.u32 %v3501_v43, %v2980_v34  ;;  %v3587_v8 = vld [vmem:[#allocation8 + $0x3d4] sm:$0xf0]  ;;  %v3553_v9 = vld [vmem:[#allocation8 + $0x2cc] sm:$0xf]  ;;  %v3282_v58 = vld [vmem:[#allocation8 + $0x388] sm:$0xf] }
 0x105   :  { %2135 = vmatpush.bf16.msra.mxu0 %v2935_v35  ;;  %v1091_v25 = vpop.f32.mrf.mxu0  ;;  %v3465_v35 = vld [vmem:[#allocation8 + $0xc] sm:$0xf]  ;;  %2073 = vmatpush.bf16.msra.mxu3 %v3263_v28  ;;  %v1103_v44 = vadd.f32 %v1102_v7, %v1090_v32  ;;  %v3047_v7 = vor.u32 %v3517_v63, %v3044_v3  ;;  %v3234_v34 = vld [vmem:[#allocation8 + $0x328] sm:$0xf] }
 0x106   :  { %v1065_v31 = vpop.f32.mrf.mxu2  ;;  %v2839_v46 = vor.u32 %v3465_v35, %v2836_v36  ;;  %v3505_v25 = vld [vmem:[#allocation8 + $0x14c] sm:$0xf] }
 0x107   :  { %v3155_v31 = vor.u32 %v3547_v23, %v3154_v22  ;;  %v2999_v47 = vor.u32 %v3505_v25, %v2996_v26  ;;  %v3557_v63 = vld [vmem:[#allocation8 + $0x2ec] sm:$0xf]  ;;  %v3266_v22 = vld [vmem:[#allocation8 + $0x368] sm:$0xf]  ;;  %v3575_v23 = vld [vmem:[#allocation8 + $0x374] sm:$0xf0] }
 0x108   :  { %v1078_v39 = vpop.f32.mrf.mxu3  ;;  %2101 = vmatpush.bf16.msrb.mxu1 %v2979_v33  ;;  %v3138_v33 = vld [vmem:[#allocation8 + $0x268] sm:$0xf]  ;;  %v3541_v25 = vld [vmem:[#allocation8 + $0x26c] sm:$0xf]  ;;  %v3140_v26 = vld [vmem:[#allocation8 + $0x278] sm:$0xf0] }
 0x109   :  { %2136 = vmatpush.bf16.msra.mxu0 %v2919_v48  ;;  %v3079_v48 = vor.u32 %v3525_v40, %v3076_v41  ;;  %2074 = vmatpush.bf16.msra.mxu3 %v3247_v42  ;;  %v3122_v39 = vld [vmem:[#allocation8 + $0x248] sm:$0xf]  ;;  %v3539_v40 = vld [vmem:[#allocation8 + $0x254] sm:$0xf0]  ;;  %v3497_v41 = vld [vmem:[#allocation8 + $0x10c] sm:$0xf] }
 0x10a   :  { %v2964_v42 = vld [vmem:[#allocation8 + $0x118] sm:$0xf0] }
 0x10c   :  { %2102 = vmatpush.bf16.msrb.mxu1 %v2963_v45 }
 0x10d   :  { %2137 = vmatpush.bf16.msra.mxu0 %v2903_v61  ;;  %v3063_v61 = vor.u32 %v3521_v51, %v3060_v52  ;;  %2075 = vmatpush.bf16.msra.mxu3 %v3231_v53  ;;  %v3107_v53 = vor.u32 %v3535_v50, %v3106_v49  ;;  %v3585_v50 = vld [vmem:[#allocation8 + $0x3cc] sm:$0xf] }
 0x10e   :  { %v1115_v55 = vpop.f32.mrf.mxu2 }
 0x10f   :  { %v1116_v56 = vadd.f32 %v1115_v55, %v1103_v44  ;;  %2103 = vmatmul.bf16.vlgmr.msrb.gmra.mxu1 %v3896_v24 }
 0x110   :  { %2147 = vmatpush.bf16.msra.mxu1 %v3079_v48  ;;  %v2967_v48 = vor.u32 %v3497_v41, %v2964_v42  ;;  %v3529_v41 = vld [vmem:[#allocation8 + $0x20c] sm:$0xf]  ;;  %v3092_v42 = vld [vmem:[#allocation8 + $0x218] sm:$0xf0] }
 0x111   :  { %2138 = vmatpush.bf16.msra.mxu0 %v2887_v11  ;;  %vm1186_vm4 = vcmp.ge.f32.partialorder %v1116_v56, 0.0  ;;  %v1190_v2 = vmul.f32 0.2, %v1116_v56  ;;  %v3513_v11 = vld [vmem:[#allocation8 + $0x18c] sm:$0xf]  ;;  %2076 = vmatpush.bf16.msra.mxu3 %v3215_v54 }
 0x113   :  { %v1194_v4 = vsel %vm1186_vm4, %v1116_v56, %v1190_v2  ;;  %v3090_v56 = vld [vmem:[#allocation8 + $0x208] sm:$0xf] }
 0x114   :  { %v3904_v6 = vpack.c.bf16 %v1194_v4, %v1194_v4  ;;  %2148 = vmatpush.bf16.msra.mxu1 %v3063_v61  ;;  %v3591_v61 = vld [vmem:[#allocation8 + $0x3f4] sm:$0xf0]  ;;  %v3091_v2 = vor.u32 %v3531_v57, %v3090_v56  ;;  %v3207_v4 = vor.u32 %v3557_v63, %v3204_v0  ;;  %v3300_v56 = vld [vmem:[#allocation8 + $0x3b8] sm:$0xf0] }
 0x115   :  { %2139 = vmatpush.bf16.msra.mxu0 %v2871_v19  ;;  %v3171_v19 = vor.u32 %v3551_v15, %v3170_v14  ;;  %v3331_v54 = vor.u32 %v3591_v61, %v3330_v59  ;;  %v3172_v14 = vld [vmem:[#allocation8 + $0x2b8] sm:$0xf0]  ;;  %v3577_v59 = vld [vmem:[#allocation8 + $0x38c] sm:$0xf] }
 0x116   :  { %2012 = vmatmul.bf16.vlgmr.msrb.gmra.mxu2 %v3904_v6  ;;  %v1117_v60 = vpop.f32.mrf.mxu2  ;;  %v3284_v61 = vld [vmem:[#allocation8 + $0x398] sm:$0xf0] }
 0x117   :  { %2108 = vmatpush.bf16.msrb.mxu2 %v3203_v5  ;;  %v3314_v5 = vld [vmem:[#allocation8 + $0x3c8] sm:$0xf]  ;;  %v3287_v63 = vor.u32 %v3577_v59, %v3284_v61 }
 0x118   :  { %2149 = vmatpush.bf16.msra.mxu1 %v3047_v7  ;;  %v3315_v60 = vor.u32 %v3587_v8, %v3314_v5 }
 0x119   :  { %2140 = vmatpush.bf16.msra.mxu0 %v2855_v29  ;;  %v3543_v29 = vld [vmem:[#allocation8 + $0x274] sm:$0xf0] }
 0x11a   :  { %v3139_v36 = vor.u32 %v3543_v29, %v3138_v33  ;;  %v3124_v33 = vld [vmem:[#allocation8 + $0x258] sm:$0xf0] }
 0x11b   :  { %2109 = vmatpush.bf16.msrb.mxu2 %v3187_v12  ;;  %v1154_v20 = vpop.f32.mrf.mxu1 }
 0x11d   :  { %2141 = vmatpush.bf16.msra.mxu0 %v2839_v46  ;;  %v1141_v13 = vpop.f32.mrf.mxu0  ;;  %v3123_v46 = vor.u32 %v3539_v40, %v3122_v39  ;;  %v3218_v39 = vld [vmem:[#allocation8 + $0x308] sm:$0xf]  ;;  %v3563_v40 = vld [vmem:[#allocation8 + $0x314] sm:$0xf0] }
 0x11f   :  { %2110 = vmatpush.bf16.msrb.mxu2 %v3171_v19  ;;  %v3156_v19 = vld [vmem:[#allocation8 + $0x298] sm:$0xf0] }
 0x120   :  { %2142 = vmatmul.bf16.vlgmr.msra.gmra.mxu0 %v3891_v62  ;;  %v3031_v62 = vor.u32 %v3513_v11, %v3028_v10  ;;  %v1128_v18 = vpop.f32.mrf.mxu3  ;;  %v3188_v11 = vld [vmem:[#allocation8 + $0x2d8] sm:$0xf0] }
 0x121   :  { %v1129_v27 = vadd.f32 %v1128_v18, %v235_v17  ;;  %v3191_v12 = vor.u32 %v3553_v9, %v3188_v11  ;;  %v3579_v17 = vld [vmem:[#allocation8 + $0x394] sm:$0xf0]  ;;  %v3545_v18 = vld [vmem:[#allocation8 + $0x28c] sm:$0xf] }
 0x122   :  { %2150 = vmatpush.bf16.msra.mxu1 %v3031_v62  ;;  %v1167_v28 = vpop.f32.mrf.mxu2  ;;  %v3298_v62 = vld [vmem:[#allocation8 + $0x3a8] sm:$0xf]  ;;  %v3565_v9 = vld [vmem:[#allocation8 + $0x32c] sm:$0xf] }
 0x123   :  { %v1142_v30 = vadd.f32 %v1141_v13, %v1129_v27  ;;  %2111 = vmatpush.bf16.msrb.mxu2 %v3155_v31  ;;  %v1156_v37 = vpop.f32.mrf.mxu1  ;;  %v3549_v13 = vld [vmem:[#allocation8 + $0x2ac] sm:$0xf]  ;;  %v3267_v27 = vor.u32 %v3575_v23, %v3266_v22  ;;  %v3250_v31 = vld [vmem:[#allocation8 + $0x348] sm:$0xf] }
 0x124   :  { %v3175_v16 = vor.u32 %v3549_v13, %v3172_v14 }
 0x125   :  { %v1143_v32 = vpop.f32.mrf.mxu0  ;;  %v1155_v44 = vadd.f32 %v1154_v20, %v1142_v30  ;;  %v3283_v20 = vor.u32 %v3579_v17, %v3282_v58  ;;  %v3567_v30 = vld [vmem:[#allocation8 + $0x334] sm:$0xf0] }
 0x126   :  { %2151 = vmatpush.bf16.msra.mxu1 %v3015_v21  ;;  %2064 = vmatmul.bf16.vlgmr.msra.gmra.mxu2 %v3904_v6  ;;  %v3159_v21 = vor.u32 %v3545_v18, %v3156_v19  ;;  %v3537_v32 = vld [vmem:[#allocation8 + $0x24c] sm:$0xf]  ;;  %v3235_v37 = vor.u32 %v3567_v30, %v3234_v34 }
 0x127   :  { %2112 = vmatpush.bf16.msrb.mxu2 %v3139_v36  ;;  %v1168_v51 = vadd.f32 %v1167_v28, %v1155_v44  ;;  %v3143_v28 = vor.u32 %v3541_v25, %v3140_v26  ;;  %v3127_v43 = vor.u32 %v3537_v32, %v3124_v33  ;;  %v3108_v36 = vld [vmem:[#allocation8 + $0x238] sm:$0xf0]  ;;  %v3589_v44 = vld [vmem:[#allocation8 + $0x3ec] sm:$0xf] }
 0x128   :  { %v1130_v35 = vpop.f32.mrf.mxu3 }
 0x129   :  { %v3533_v35 = vld [vmem:[#allocation8 + $0x22c] sm:$0xf] }
 0x12a   :  { %2152 = vmatpush.bf16.msra.mxu1 %v2999_v47  ;;  %v1169_v45 = vpop.f32.mrf.mxu2  ;;  %v3571_v47 = vld [vmem:[#allocation8 + $0x354] sm:$0xf0] }
 0x12b   :  { %2113 = vmatpush.bf16.msrb.mxu2 %v3123_v46  ;;  %v3251_v29 = vor.u32 %v3571_v47, %v3250_v31  ;;  %v3332_v45 = vld [vmem:[#allocation8 + $0x3f8] sm:$0xf0]  ;;  %v3219_v46 = vor.u32 %v3563_v40, %v3218_v39 }
 0x12c   :  { %v3335_v49 = vor.u32 %v3589_v44, %v3332_v45 }
 0x12e   :  { %2153 = vmatpush.bf16.msra.mxu1 %v2983_v38  ;;  %v3111_v38 = vor.u32 %v3533_v35, %v3108_v36  ;;  %v2191_v36 = vlaneseq }
 0x12f   :  { %2114 = vmatpush.bf16.msrb.mxu2 %v3107_v53 }
 0x130   :  { %v1180_v52 = vpop.f32.mrf.mxu3  ;;  %v3922_v39 = vshrl.u32 %v2191_v36, 7 }
 0x131   :  { %v1181_v55 = vadd.f32 %v1180_v52, %v1168_v51  ;;  %v3316_v51 = vld [vmem:[#allocation8 + $0x3d8] sm:$0xf0] }
 0x132   :  { %2154 = vmatpush.bf16.msra.mxu1 %v2967_v48  ;;  %v3095_v48 = vor.u32 %v3529_v41, %v3092_v42  ;;  %v3319_v52 = vor.u32 %v3585_v50, %v3316_v51  ;;  %vm2195_vm6 = vcmp.lt.s32.totalorder %v3922_v39, 2 }
 0x133   :  { %vm1187_vm5 = vcmp.ge.f32.partialorder %v1181_v55, 0.0  ;;  %v1191_v1 = vmul.f32 0.2, %v1181_v55  ;;  %2115 = vmatpush.bf16.msrb.mxu2 %v3091_v2  ;;  %v3268_v2 = vld [vmem:[#allocation8 + $0x378] sm:$0xf0] }
 0x135   :  { %2155 = vmatmul.bf16.vlgmr.msra.gmra.mxu1 %v3896_v24  ;;  %v1195_v3 = vsel %vm1187_vm5, %v1181_v55, %v1191_v1  ;;  %v3583_v24 = vld [vmem:[#allocation8 + $0x3b4] sm:$0xf0]  ;;  %v3581_v55 = vld [vmem:[#allocation8 + $0x3ac] sm:$0xf] }
 0x136   :  { %v3910_v7 = vpack.c.bf16 %v1195_v3, %v1195_v3  ;;  %2116 = vmatmul.bf16.vlgmr.msrb.gmra.mxu2 %v3904_v6  ;;  %v3299_v15 = vor.u32 %v3583_v24, %v3298_v62  ;;  %v3303_v57 = vor.u32 %v3581_v55, %v3300_v56  ;;  %v3573_v1 = vld [vmem:[#allocation8 + $0x36c] sm:$0xf] }
 0x137   :  { %2160 = vmatpush.bf16.msra.mxu2 %v3207_v4  ;;  %v3271_v3 = vor.u32 %v3573_v1, %v3268_v2  ;;  %v3252_v4 = vld [vmem:[#allocation8 + $0x358] sm:$0xf0] }
 0x138   :  { %v1182_v10 = vpop.f32.mrf.mxu3  ;;  %2025 = vmatmul.bf16.vlgmr.msrb.gmra.mxu3 %v3910_v7 }
 0x139   :  { %2121 = vmatpush.bf16.msrb.mxu3 %v3331_v54  ;;  %v3569_v54 = vld [vmem:[#allocation8 + $0x34c] sm:$0xf] }
 0x13a   :  { %v3255_v5 = vor.u32 %v3569_v54, %v3252_v4  ;;  %v3561_v10 = vld [vmem:[#allocation8 + $0x30c] sm:$0xf] }
 0x13b   :  { %2161 = vmatpush.bf16.msra.mxu2 %v3191_v12  ;;  %v1328_v12 = vld [vmem:[#allocation10] sm:$0xf] }
 0x13c   :  { %v1330_v24 = vperm.slane %v1328_v12, 0  ;;  %v1331_v18 = vperm.slane %v1328_v12, 1  ;;  %v1332_v25 = vperm.slane %v1328_v12, 2 }
 0x13d   :  { %2122 = vmatpush.bf16.msrb.mxu3 %v3315_v60  ;;  %v3220_v60 = vld [vmem:[#allocation8 + $0x318] sm:$0xf0] }
 0x13e   :  { %v3223_v62 = vor.u32 %v3561_v10, %v3220_v60 }
 0x13f   :  { %2162 = vmatpush.bf16.msra.mxu2 %v3175_v16 }
 0x141   :  { %2123 = vmatpush.bf16.msrb.mxu3 %v3299_v15 }
 0x143   :  { %2163 = vmatpush.bf16.msra.mxu2 %v3159_v21 }
 0x145   :  { %2124 = vmatpush.bf16.msrb.mxu3 %v3283_v20 }
 0x147   :  { %2164 = vmatpush.bf16.msra.mxu2 %v3143_v28 }
 0x148   :  { %2077 = vmatmul.bf16.vlgmr.msra.gmra.mxu3 %v3910_v7 }
 0x149   :  { %2125 = vmatpush.bf16.msrb.mxu3 %v3267_v27 }
 0x14b   :  { %2165 = vmatpush.bf16.msra.mxu2 %v3127_v43 }
 0x14d   :  { %2126 = vmatpush.bf16.msrb.mxu3 %v3251_v29  ;;  %v1987_v53 = vpop.f32.mrf.mxu0 }
 0x14e   :  { %v1988_v14 = vadd.f32 %v1987_v53, %v1330_v24 }
 0x14f   :  { %2166 = vmatpush.bf16.msra.mxu2 %v3111_v38 }
 0x151   :  { %2127 = vmatpush.bf16.msrb.mxu3 %v3235_v37 }
 0x153   :  { %2167 = vmatpush.bf16.msra.mxu2 %v3095_v48 }
 0x155   :  { %2128 = vmatpush.bf16.msrb.mxu3 %v3219_v46  ;;  %v1989_v0 = vpop.f32.mrf.mxu0 }
 0x156   :  { %2168 = vmatmul.bf16.vlgmr.msra.gmra.mxu2 %v3904_v6  ;;  %v3236_v6 = vld [vmem:[#allocation8 + $0x338] sm:$0xf0] }
 0x157   :  { %v3239_v11 = vor.u32 %v3565_v9, %v3236_v6 }
 0x158   :  { %2129 = vmatmul.bf16.vlgmr.msrb.gmra.mxu3 %v3910_v7 }
 0x159   :  { %2173 = vmatpush.bf16.msra.mxu3 %v3335_v49 }
 0x15d   :  { %2174 = vmatpush.bf16.msra.mxu3 %v3319_v52  ;;  %v2039_v8 = vpop.f32.mrf.mxu0 }
 0x15e   :  { %v2040_v20 = vadd.f32 %v2039_v8, %v1331_v18 }
 0x161   :  { %2175 = vmatpush.bf16.msra.mxu3 %v3303_v57 }
 0x165   :  { %2176 = vmatpush.bf16.msra.mxu3 %v3287_v63  ;;  %v2041_v13 = vpop.f32.mrf.mxu0 }
 0x169   :  { %2177 = vmatpush.bf16.msra.mxu3 %v3271_v3 }
 0x16c   :  { %v2000_v15 = vpop.f32.mrf.mxu1 }
 0x16d   :  { %2178 = vmatpush.bf16.msra.mxu3 %v3255_v5  ;;  %v2001_v16 = vadd.f32 %v2000_v15, %v1988_v14 }
 0x171   :  { %2179 = vmatpush.bf16.msra.mxu3 %v3239_v11 }
 0x174   :  { %v2002_v17 = vpop.f32.mrf.mxu1 }
 0x175   :  { %2180 = vmatpush.bf16.msra.mxu3 %v3223_v62 }
 0x178   :  { %2181 = vmatmul.bf16.vlgmr.msra.gmra.mxu3 %v3910_v7  ;;  %v1333_v7 = vperm.slane %v1328_v12, 3 }
 0x17c   :  { %v2052_v21 = vpop.f32.mrf.mxu1 }
 0x17d   :  { %v2091_v58 = vpop.f32.mrf.mxu0  ;;  %v2053_v22 = vadd.f32 %v2052_v21, %v2040_v20 }
 0x17e   :  { %v2092_v26 = vadd.f32 %v2091_v58, %v1332_v25 }
 0x184   :  { %v2054_v23 = vpop.f32.mrf.mxu1 }
 0x185   :  { %v2093_v19 = vpop.f32.mrf.mxu0 }
 0x18c   :  { %v2104_v28 = vpop.f32.mrf.mxu1 }
 0x18d   :  { %v3918_v31 = vadd.f32 %v2104_v28, %v2092_v26 }
 0x194   :  { %v2106_v32 = vpop.f32.mrf.mxu1 }
 0x199   :  { %v2013_v33 = vpop.f32.mrf.mxu2 }
 0x19a   :  { %v2014_v40 = vadd.f32 %v2013_v33, %v2001_v16 }
 0x19d   :  { %v2143_v27 = vpop.f32.mrf.mxu0 }
 0x19e   :  { %v2144_v34 = vadd.f32 %v2143_v27, %v1333_v7 }
 0x1a1   :  { %v2015_v29 = vpop.f32.mrf.mxu2 }
 0x1a5   :  { %v2145_v47 = vpop.f32.mrf.mxu0 }
 0x1a9   :  { %v2065_v43 = vpop.f32.mrf.mxu2 }
 0x1aa   :  { %v2066_v52 = vadd.f32 %v2065_v43, %v2053_v22 }
 0x1b1   :  { %v2067_v37 = vpop.f32.mrf.mxu2 }
 0x1b2   :  { %v2156_v30 = vpop.f32.mrf.mxu1 }
 0x1b3   :  { %v3920_v35 = vadd.f32 %v2156_v30, %v2144_v34 }
 0x1b9   :  { %v2117_v44 = vpop.f32.mrf.mxu2 }
 0x1ba   :  { %v2158_v38 = vpop.f32.mrf.mxu1  ;;  %v2118_v23 = vadd.f32 %v2117_v44, %v3918_v31 }
 0x1bb   :  { %v2026_v41 = vpop.f32.mrf.mxu3 }
 0x1bc   :  { %v2027_v42 = vadd.f32 %v2026_v41, %v2014_v40 }
 0x1be   :  { %v2198_v45 = vsel %vm2195_vm6, %v2027_v42, 0.0 }
 0x1bf   :  { %v2226_v46 = vmul.f32 %v2198_v45, %v2198_v45  ;;  %v2202_v51 = vrot.slane %v2198_v45, 4 }
 0x1c1   :  { %v2119_v49 = vpop.f32.mrf.mxu2  ;;  %v2230_v50 = vrot.slane %v2226_v46, 4  ;;  %v2203_v57 = vadd.f32 %v2202_v51, %v2198_v45 }
 0x1c3   :  { %v2028_v48 = vpop.f32.mrf.mxu3  ;;  %v2231_v53 = vadd.f32 %v2230_v50, %v2226_v46  ;;  %v2204_v2 = vrot.slane %v2203_v57, 2 }
 0x1c5   :  { %v2232_v63 = vrot.slane %v2231_v53, 2  ;;  %v2205_v6 = vadd.f32 %v2204_v2, %v2203_v57 }
 0x1c7   :  { %v2233_v4 = vadd.f32 %v2232_v63, %v2231_v53  ;;  %v2206_v24 = vrot.slane %v2205_v6, 1 }
 0x1c9   :  { %v2234_v60 = vrot.slane %v2233_v4, 1  ;;  %v2207_v18 = vadd.f32 %v2206_v24, %v2205_v6 }
 0x1cb   :  { %v2078_v55 = vpop.f32.mrf.mxu3  ;;  %v2235_v14 = vadd.f32 %v2234_v60, %v2233_v4 }
 0x1cc   :  { %v2079_v56 = vadd.f32 %v2078_v55, %v2066_v52 }
 0x1cd   :  { %v2254_v21 = vsel %vm911_vm0, %v2207_v18, %v2235_v14 }
 0x1ce   :  { %v2186_v59 = vpack.c.bf16 %v2079_v56, %v2027_v42  ;;  %v2199_v61 = vsel %vm2195_vm6, %v2079_v56, 0.0 }
 0x1cf   :  { %v2208_v0 = vrot.slane %v2199_v61, 4  ;;  %v2227_v1 = vmul.f32 %v2199_v61, %v2199_v61 }
 0x1d0   :  { %2188 = vst [vmem:[#allocation11] sm:$0xff] %v2186_v59 }
 0x1d1   :  { %v2209_v3 = vadd.f32 %v2208_v0, %v2199_v61  ;;  %v2236_v54 = vrot.slane %v2227_v1, 4 }
 0x1d3   :  { %v2210_v5 = vrot.slane %v2209_v3, 2  ;;  %v2237_v8 = vadd.f32 %v2236_v54, %v2227_v1  ;;  %v2080_v9 = vpop.f32.mrf.mxu3 }
 0x1d5   :  { %v2211_v11 = vadd.f32 %v2210_v5, %v2209_v3  ;;  %v2238_v10 = vrot.slane %v2237_v8, 2 }
 0x1d7   :  { %v2212_v12 = vrot.slane %v2211_v11, 1  ;;  %v2239_v62 = vadd.f32 %v2238_v10, %v2237_v8 }
 0x1d9   :  { %v2240_v13 = vrot.slane %v2239_v62, 1  ;;  %v2213_v15 = vadd.f32 %v2212_v12, %v2211_v11  ;;  %v2169_v58 = vpop.f32.mrf.mxu2 }
 0x1da   :  { %v2170_v43 = vadd.f32 %v2169_v58, %v3920_v35 }
 0x1db   :  { %v2241_v16 = vadd.f32 %v2240_v13, %v2239_v62  ;;  %v2130_v17 = vpop.f32.mrf.mxu3 }
 0x1dc   :  { %v2131_v27 = vadd.f32 %v2130_v17, %v2118_v23 }
 0x1dd   :  { %v2255_v19 = vsel %vm911_vm0, %v2213_v15, %v2241_v16 }
 0x1de   :  { %v2262_v20 = vrot.slane %v2255_v19, 6  ;;  %v2200_v28 = vsel %vm2195_vm6, %v2131_v27, 0.0 }
 0x1df   :  { %v2228_v47 = vmul.f32 %v2200_v28, %v2200_v28  ;;  %v2214_v33 = vrot.slane %v2200_v28, 4 }
 0x1e0   :  { %v2266_v22 = vsel %vm2265_vm7, %v2254_v21, %v2262_v20 }
 0x1e1   :  { %v2171_v25 = vpop.f32.mrf.mxu2  ;;  %v2242_v32 = vrot.slane %v2228_v47, 4  ;;  %v2215_v7 = vadd.f32 %v2214_v33, %v2200_v28 }
 0x1e3   :  { %v2132_v26 = vpop.f32.mrf.mxu3  ;;  %v2243_v29 = vadd.f32 %v2242_v32, %v2228_v47  ;;  %v2216_v36 = vrot.slane %v2215_v7, 2 }
 0x1e5   :  { %v2244_v34 = vrot.slane %v2243_v29, 2  ;;  %v2217_v35 = vadd.f32 %v2216_v36, %v2215_v7 }
 0x1e7   :  { %v2245_v40 = vadd.f32 %v2244_v34, %v2243_v29  ;;  %v2218_v51 = vrot.slane %v2217_v35, 1 }
 0x1e9   :  { %v2246_v46 = vrot.slane %v2245_v40, 1  ;;  %v2219_v57 = vadd.f32 %v2218_v51, %v2217_v35 }
 0x1eb   :  { %v2247_v55 = vadd.f32 %v2246_v46, %v2245_v40 }
 0x1ed   :  { %v2256_v0 = vsel %vm911_vm0, %v2219_v57, %v2247_v55 }
 0x1ee   :  { %v2263_v2 = vrot.slane %v2256_v0, 4 }
 0x1fb   :  { %v2182_v30 = vpop.f32.mrf.mxu3 }
 0x1fc   :  { %v2183_v31 = vadd.f32 %v2182_v30, %v2170_v43 }
 0x1fe   :  { %v2187_v37 = vpack.c.bf16 %v2183_v31, %v2131_v27  ;;  %v2201_v38 = vsel %vm2195_vm6, %v2183_v31, 0.0 }
 0x1ff   :  { %v2220_v41 = vrot.slane %v2201_v38, 4  ;;  %v2229_v42 = vmul.f32 %v2201_v38, %v2201_v38 }
 0x200   :  { %2189 = vst [vmem:[#allocation11 + $0x8] sm:$0xff] %v2187_v37 }
 0x201   :  { %v2221_v44 = vadd.f32 %v2220_v41, %v2201_v38  ;;  %v2248_v45 = vrot.slane %v2229_v42, 4  ;;  %2283 = dma.vmem_to_hbm [thread:$0]  %s2279_s4, 256, %s2281_s23, [#allocation4]  }
 0x203   :  { %v2222_v48 = vrot.slane %v2221_v44, 2  ;;  %v2249_v49 = vadd.f32 %v2248_v45, %v2229_v42  ;;  %v2184_v50 = vpop.f32.mrf.mxu3 }
 0x205   :  { %v2223_v52 = vadd.f32 %v2222_v48, %v2221_v44  ;;  %v2250_v53 = vrot.slane %v2249_v49, 2 }
 0x207   :  { %v2224_v39 = vrot.slane %v2223_v52, 1  ;;  %v2251_v56 = vadd.f32 %v2250_v53, %v2249_v49 }
 0x209   :  { %v2252_v59 = vrot.slane %v2251_v56, 1  ;;  %v2225_v61 = vadd.f32 %v2224_v39, %v2223_v52 }
 0x20b   :  { %v2253_v63 = vadd.f32 %v2252_v59, %v2251_v56 }
 0x20d   :  { %v2257_v1 = vsel %vm911_vm0, %v2225_v61, %v2253_v63 }
 0x20e   :  { %v2264_v3 = vrot.slane %v2257_v1, 2 }
 0x210   :  { %v2268_v54 = vsel %vm2267_vm8, %v2263_v2, %v2264_v3 }
 0x211   :  { %v2270_v4 = vsel %vm2269_vm9, %v2266_v22, %v2268_v54 }
 0x212   :  { %2272 = vst [vmem:[#allocation12] sm:$0xff] %v2270_v4 }
 0x213   :  { %2294 = dma.vmem_to_hbm [thread:$0]  %s2290_s24, 128, %s2292_s27, [#allocation13]  }
 0x214   :  { %3775 = dma.done.wait [#allocation4], 256  }
 0x215   :  { %3776 = vsyncadd [#allocation4], 4294967040 }
 0x216   :  { %3777 = dma.done.wait [#allocation13], 128  }
 0x217   :  { %3778 = vsyncadd [#allocation13], 4294967168 }
 0x218   :  { %2303 = vsyncpa [#allocation3], 1 }
 0x219   :  { %2304 = vsyncpa [#allocation6], 1 }
 0x21a   :  { %2305 = vsyncpa [#allocation9], 1 }
 0x21b   :  { %2306 = vsyncpa [#allocation4], 1 }
 0x21c   :  { %2307 = vsyncpa [#allocation13], 1 }

</bundles_post_ra>
